<compile_context>
chip_gen: v5e
topology: v5e:2x2
jax: 0.10.0
libtpu: 0.0.40
codegen_flags: <defaults>
</compile_context>

<pallas_src>
import jax
import jax.numpy as jnp
from jax.experimental import pallas as pl
from jax.experimental.pallas import tpu as pltpu

IN_DIM = 28 * 28   # 784
HID = 512
OUT = 10
OUT_PAD = 128      # lane-dense output width (one full vreg lane span)


def _round_up(n, m):
    return ((n + m - 1) // m) * m


def mlp_kernel(x_ref, w1_ref, b1_ref, w2_ref, b2_ref, o_ref):
    # x_ref : (tb, 784) f32    w1_ref: (784, 512) bf16   b1_ref: (1, 512) f32
    # w2_ref: (512, 128) bf16  b2_ref: (1, 128)   f32    o_ref : (tb, 128) f32
    x_bf = x_ref[...].astype(jnp.bfloat16)          # in-kernel cast (VPU, free)
    h = jnp.dot(x_bf, w1_ref[...], preferred_element_type=jnp.float32)
    h = jnp.maximum(h + b1_ref[...], 0.0)           # f32 bias + ReLU epilogue
    y = jnp.dot(h.astype(jnp.bfloat16), w2_ref[...],
                preferred_element_type=jnp.float32)
    o_ref[...] = (y + b2_ref[...]).astype(o_ref.dtype)


def prepare_params(w1, b1, w2, b2):
    """One-time weight prep (hoisted out of the per-forward path).

    w1: (784, 512)  b1: (1, 512)  w2: (512, 10)  b2: (1, 10)   (float32)
    Returns bf16 W1 (784, 512), f32 b1 (1, 512), lane-padded bf16 W2
    (512, 128) and lane-padded f32 b2 (1, 128).  Padded columns are zero,
    hence exact no-ops on the first 10 output lanes.
    """
    w1_p = w1.astype(jnp.bfloat16)
    b1_p = b1.astype(jnp.float32).reshape(1, HID)
    w2_p = jnp.pad(w2.astype(jnp.bfloat16), ((0, 0), (0, OUT_PAD - OUT)))
    b2_p = jnp.pad(b2.astype(jnp.float32).reshape(1, OUT),
                   ((0, 0), (0, OUT_PAD - OUT)))
    return w1_p, b1_p, w2_p, b2_p


def _choose_tile(batch, tile_b):
    """Batch tile: multiple of 8, <= batch (so blocks never exceed the array),
    and re-balanced so multi-step grids have roughly equal steps (>= 2 steps
    keeps both v7x TensorCores busy; v5e/v6e are unaffected)."""
    if batch <= 8:
        return 8
    tb = max(8, min(_round_up(tile_b, 8), (batch // 8) * 8))
    n_steps = pl.cdiv(batch, tb)
    if n_steps > 1:
        tb = max(8, min(tb, _round_up(pl.cdiv(batch, n_steps), 8)))
    return tb


def mlp_forward(x, w1_p, b1_p, w2_p, b2_p, *, tile_b=512):
    """relu(x.view(-1, 784) @ W1 + b1) @ W2 + b2, fused in one Pallas kernel.

    x : any shape with 784 trailing elements per row (e.g. (B, 1, 28, 28)), f32.
    w1_p / b1_p / w2_p / b2_p : outputs of prepare_params().
    Returns (B, 10) float32.  tile_b=512 is a good default on v5e/v6e/v7x.
    """
    x2 = x.reshape(-1, IN_DIM)          # view-like reshape: no pad, no cast
    B = x2.shape[0]

    # Only a tiny (<8-row) batch ever needs padding; everything else relies on
    # Pallas' masked partial boundary blocks.
    Bp = B
    if B < 8:
        x2 = jnp.pad(x2, ((0, 8 - B), (0, 0)))
        Bp = 8

    tb = _choose_tile(Bp, tile_b)
    grid = (pl.cdiv(Bp, tb),)

    cost = pl.CostEstimate(
        flops=2 * Bp * (IN_DIM * HID + HID * OUT_PAD),
        transcendentals=0,
        bytes_accessed=(Bp * IN_DIM * 4 + Bp * OUT_PAD * 4
                        + (IN_DIM * HID + HID * OUT_PAD) * 2),
    )

    out = pl.pallas_call(
        mlp_kernel,
        out_shape=jax.ShapeDtypeStruct((Bp, OUT_PAD), jnp.float32),
        grid_spec=pltpu.PrefetchScalarGridSpec(
            num_scalar_prefetch=0,
            grid=grid,
            in_specs=[
                pl.BlockSpec((tb, IN_DIM), lambda i: (i, 0)),    # x tile (f32)
                pl.BlockSpec((IN_DIM, HID), lambda i: (0, 0)),   # W1 (resident)
                pl.BlockSpec((1, HID), lambda i: (0, 0)),        # b1
                pl.BlockSpec((HID, OUT_PAD), lambda i: (0, 0)),  # W2 (resident)
                pl.BlockSpec((1, OUT_PAD), lambda i: (0, 0)),    # b2
            ],
            out_specs=pl.BlockSpec((tb, OUT_PAD), lambda i: (i, 0)),
        ),
        compiler_params=pltpu.CompilerParams(
            dimension_semantics=("parallel",),   # batch steps shard across v7x's 2 TCs
            vmem_limit_bytes=32 * 1024 * 1024,   # > v5e's 16 MiB default, < v7x's 64 MiB
        ),
        cost_estimate=cost,
    )(x2, w1_p, b1_p, w2_p, b2_p)

    return out[:B, :OUT]


def init_params(key):
    # Shapes match nn.Linear(784,512) / nn.Linear(512,10); PyTorch stores
    # weight as (out,in), so transpose to (in,out) for the kernel layout.
    k1, k2, k3, k4 = jax.random.split(key, 4)
    w1_pt = jax.random.normal(k1, (HID, IN_DIM), jnp.float32) / jnp.sqrt(IN_DIM)
    b1 = jax.random.normal(k2, (1, HID), jnp.float32) * 0.01
    w2_pt = jax.random.normal(k3, (OUT, HID), jnp.float32) / jnp.sqrt(HID)
    b2 = jax.random.normal(k4, (1, OUT), jnp.float32) * 0.01
    return w1_pt.T, b1, w2_pt.T, b2


def _reference(x, w1, b1, w2, b2):
    # Mirrors the kernel's numerics: bf16 matmul operands, f32 accumulation.
    # TODO(synk): not bit-exact vs a pure-f32 PyTorch MLP (bf16 MXU operands).
    x2 = x.reshape(-1, IN_DIM).astype(jnp.bfloat16)
    h = jnp.dot(x2, w1.astype(jnp.bfloat16), preferred_element_type=jnp.float32)
    h = jnp.maximum(h + b1, 0.0)
    y = jnp.dot(h.astype(jnp.bfloat16), w2.astype(jnp.bfloat16),
                preferred_element_type=jnp.float32)
    return y + b2


if __name__ == "__main__":
    key = jax.random.PRNGKey(0)
    kx1, kx2, kp = jax.random.split(key, 3)
    w1, b1, w2, b2 = init_params(kp)
    params = prepare_params(w1, b1, w2, b2)       # one-time weight prep

    # Small MNIST-like batch (exercises a partial boundary block: 12 % 8 != 0).
    x_small = jax.random.normal(kx1, (12, 1, 28, 28), jnp.float32)
    out_small = jax.block_until_ready(mlp_forward(x_small, *params))
    assert out_small.shape == (12, OUT)
    assert jnp.allclose(out_small, _reference(x_small, w1, b1, w2, b2),
                        atol=1e-2, rtol=1e-2)

    # Larger batch: 2 balanced grid steps (264 + 256-with-masked-tail).
    x_big = jax.random.normal(kx2, (520, 1, 28, 28), jnp.float32)
    out_big = jax.block_until_ready(mlp_forward(x_big, *params))
    assert out_big.shape == (520, OUT)
    assert jnp.allclose(out_big, _reference(x_big, w1, b1, w2, b2),
                        atol=1e-2, rtol=1e-2)

    print("KERNEL_OK")
</pallas_src>

<mosaic_0001>
module attributes {stable_mosaic.version = 11 : i64} {
  func.func @mlp_kernel(%arg0: i32, %arg1: memref<8x784xf32, #tpu.memory_space<vmem>>, %arg2: memref<784x512xbf16, #tpu.memory_space<vmem>>, %arg3: memref<1x512xf32, #tpu.memory_space<vmem>>, %arg4: memref<512x128xbf16, #tpu.memory_space<vmem>>, %arg5: memref<1x128xf32, #tpu.memory_space<vmem>>, %arg6: memref<8x128xf32, #tpu.memory_space<vmem>>) attributes {dimension_semantics = [#tpu.dimension_semantics<parallel>], iteration_bounds = array<i64: 2>, scalar_prefetch = 0 : i64, scratch_operands = 0 : i64, tpu.core_type = #tpu.core_type<tc>, window_params = [{transform_indices = @transform_0, window_bounds = array<i64: 8, 784>}, {pipeline_mode = #tpu.pipeline_mode<synchronous>, transform_indices = @transform_1, window_bounds = array<i64: 784, 512>}, {pipeline_mode = #tpu.pipeline_mode<synchronous>, transform_indices = @transform_2, window_bounds = array<i64: 1, 512>}, {pipeline_mode = #tpu.pipeline_mode<synchronous>, transform_indices = @transform_3, window_bounds = array<i64: 512, 128>}, {pipeline_mode = #tpu.pipeline_mode<synchronous>, transform_indices = @transform_4, window_bounds = array<i64: 1, 128>}, {transform_indices = @transform_5, window_bounds = array<i64: 8, 128>}]} {
    %c0 = arith.constant 0 : index
    %c0_0 = arith.constant 0 : index
    %0 = vector.load %arg1[%c0, %c0_0] : memref<8x784xf32, #tpu.memory_space<vmem>>, vector<8x784xf32>
    %1 = arith.truncf %0 : vector<8x784xf32> to vector<8x784xbf16>
    %c0_1 = arith.constant 0 : index
    %c0_2 = arith.constant 0 : index
    %2 = vector.load %arg2[%c0_1, %c0_2] : memref<784x512xbf16, #tpu.memory_space<vmem>>, vector<784x512xbf16>
    %cst = arith.constant dense<0.000000e+00> : vector<8x512xf32>
    %3 = tpu.matmul %1, %2, %cst {dimension_numbers = #tpu.dot_dimension_numbers<[1], [0], [0], [1], [0, 0, 1, 1], [], []>} : vector<8x784xbf16>, vector<784x512xbf16>, vector<8x512xf32> -> vector<8x512xf32>
    %c0_3 = arith.constant 0 : index
    %c0_4 = arith.constant 0 : index
    %4 = vector.load %arg3[%c0_3, %c0_4] : memref<1x512xf32, #tpu.memory_space<vmem>>, vector<1x512xf32>
    %5 = vector.broadcast %4 : vector<1x512xf32> to vector<8x512xf32>
    %6 = arith.addf %3, %5 : vector<8x512xf32>
    %cst_5 = arith.constant 0.000000e+00 : f32
    %7 = vector.broadcast %cst_5 : f32 to vector<8x512xf32>
    %8 = arith.maximumf %6, %7 : vector<8x512xf32>
    %9 = arith.truncf %8 : vector<8x512xf32> to vector<8x512xbf16>
    %c0_6 = arith.constant 0 : index
    %c0_7 = arith.constant 0 : index
    %10 = vector.load %arg4[%c0_6, %c0_7] : memref<512x128xbf16, #tpu.memory_space<vmem>>, vector<512x128xbf16>
    %cst_8 = arith.constant dense<0.000000e+00> : vector<8x128xf32>
    %11 = tpu.matmul %9, %10, %cst_8 {dimension_numbers = #tpu.dot_dimension_numbers<[1], [0], [0], [1], [0, 0, 1, 1], [], []>} : vector<8x512xbf16>, vector<512x128xbf16>, vector<8x128xf32> -> vector<8x128xf32>
    %c0_9 = arith.constant 0 : index
    %c0_10 = arith.constant 0 : index
    %12 = vector.load %arg5[%c0_9, %c0_10] : memref<1x128xf32, #tpu.memory_space<vmem>>, vector<1x128xf32>
    %13 = vector.broadcast %12 : vector<1x128xf32> to vector<8x128xf32>
    %14 = arith.addf %11, %13 : vector<8x128xf32>
    %c0_11 = arith.constant 0 : index
    %c0_12 = arith.constant 0 : index
    %15 = vector.load %arg6[%c0_11, %c0_12] : memref<8x128xf32, #tpu.memory_space<vmem>>, vector<8x128xf32>
    tpu.vector_store %arg6[%c0_11, %c0_12], %14 {strides = array<i32>} : memref<8x128xf32, #tpu.memory_space<vmem>>, vector<8x128xf32>,
    return
  }
  func.func @transform_0(%arg0: i32) -> (i32, i32) {
    %c0_i32 = arith.constant 0 : i32
    %c0_i32_0 = arith.constant 0 : i32
    return %arg0, %c0_i32 : i32, i32
  }
  func.func @transform_1(%arg0: i32) -> (i32, i32) {
    %c0_i32 = arith.constant 0 : i32
    %c0_i32_0 = arith.constant 0 : i32
    %c0_i32_1 = arith.constant 0 : i32
    return %c0_i32, %c0_i32_0 : i32, i32
  }
  func.func @transform_2(%arg0: i32) -> (i32, i32) {
    %c0_i32 = arith.constant 0 : i32
    %c0_i32_0 = arith.constant 0 : i32
    %c0_i32_1 = arith.constant 0 : i32
    return %c0_i32, %c0_i32_0 : i32, i32
  }
  func.func @transform_3(%arg0: i32) -> (i32, i32) {
    %c0_i32 = arith.constant 0 : i32
    %c0_i32_0 = arith.constant 0 : i32
    %c0_i32_1 = arith.constant 0 : i32
    return %c0_i32, %c0_i32_0 : i32, i32
  }
  func.func @transform_4(%arg0: i32) -> (i32, i32) {
    %c0_i32 = arith.constant 0 : i32
    %c0_i32_0 = arith.constant 0 : i32
    %c0_i32_1 = arith.constant 0 : i32
    return %c0_i32, %c0_i32_0 : i32, i32
  }
  func.func @transform_5(%arg0: i32) -> (i32, i32) {
    %c0_i32 = arith.constant 0 : i32
    %c0_i32_0 = arith.constant 0 : i32
    return %arg0, %c0_i32 : i32, i32
  }
}

</mosaic_0001>

<bundles_post_ra>
// kernel: tpu_custom_call.1
= control target key start
LH: loop header
LB: loop body
LE: loop exit
PB: predicated region body
PF: predicated region fallthrough
CT: control target
= control target key end

     0   :  { %s4007_s0 = inlined_call_operand.hbm [shape: f32[12,784], index: 0, kind: input, shape index: {}]   ;;  %s4008_s1 = inlined_call_operand.hbm [shape: bf16[784,512], index: 1, kind: input, shape index: {}]   ;;  %s4009_s2 = inlined_call_operand.hbm [shape: f32[1,512], index: 2, kind: input, shape index: {}]   ;;  %s4010_s3 = inlined_call_operand.hbm [shape: bf16[512,128], index: 3, kind: input, shape index: {}]   ;;  %s4011_s4 = inlined_call_operand.vmem [shape: f32[1,128], index: 4, kind: input, shape index: {}]   ;;  %s4012_s5 = inlined_call_operand.hbm [shape: f32[12,128], index: 5, kind: output, shape index: {}]  }
   0x1   :  { %4013 = sst [smem:[#allocation15_spill]] %s4008_s1 }
   0x2   :  { %4014 = sst [smem:[#allocation16_spill]] %s4009_s2 }
   0x3   :  { %10 = vsyncpa [#allocation3], 0 }
   0x4   :  { %12 = vsyncpa [#allocation3 + $0x1], 0 }
   0x5   :  { %13 = vsyncpa [#allocation6], 0 }
   0x6   :  { %14 = vsyncpa [#allocation9], 0 }
   0x7   :  { %15 = vsyncpa [#allocation4], 0 }
   0x8   :  { %17 = vsyncpa [#allocation4 + $0x1], 0  ;;  %s3774_s18 = smov 0   ;;  %s3776_s19 = smov 0  }
   0x9   :  { %s3778_s20 = smov 0   ;;  %s3780_s21 = smov 0  }
   0xa LB: > { %s4015_s1 = sld [smem:[#allocation15_spill]]  ;;  %s3798_s25 = sadd.s32 4294967295, %s3735_s21   ;;  %s3735_s21 = sphi %s3780_s21, %s4027_s21   ;;  %s3731_s20 = sphi %s3778_s20, %s4026_s20   ;;  %s3727_s19 = sphi %s3776_s19, %s4025_s19   ;;  %s3723_s18 = sphi %s3774_s18, %s4024_s18  }
   0xb   : > { %p2297_p0 = scmp.ge.s32.totalorder %s3735_s21, 1  ;;  %p44_p1 = scmp.eq.s32.totalorder %s3798_s25, 0 }
   0xc   : > { %p164_p2 = scmp.lt.s32.totalorder %s3735_s21, 3  ;;  %s3737_s27 = smov [#allocation5]  }
   0xd   : > { %s177_s28 = sshll.u32 %s3737_s27, 4  ;;  %s4017_s2 = sld [smem:[#allocation16_spill]]  ;;  %s178_s28 = int_to_ptr.vmem [resolvable:$true] %s177_s28 }
   0xe   : > { %p3803_p3 = pnand %p2297_p0, %p164_p2  ;;  %s201_s10 = sshll.u32 %s4010_s3, 4  ;;  %s202_s10 = int_to_ptr.hbm [resolvable:$true] %s201_s10 }
   0xf   : > { %s3738_s11 = smov [#allocation7]   ;;  %s3739_s13 = smov 256  }
  0x10   : > { %s175_s24 = sshll.u32 %s4015_s1, 4  ;;  %p3475_p4 = pneg %p3803_p3  ;;  %s176_s24 = int_to_ptr.hbm [resolvable:$true] %s175_s24 }
  0x11   : > { %s192_s12 = sshll.u32 %s3738_s11, 4  ;;  %s3740_s14 = smov 16   ;;  %s193_s12 = int_to_ptr.vmem [resolvable:$true] %s192_s12 }
  0x12   : > { %p3815_p6 = pnand %p3475_p4, %p44_p1  ;;  %s3741_s15 = smov [#allocation8]  }
  0x13   : > { %s190_s6 = sshll.u32 %s4017_s2, 4  ;;  %s203_s16 = sshll.u32 %s3741_s15, 4  ;;  %s191_s6 = int_to_ptr.hbm [resolvable:$true] %s190_s6  ;;  %s204_s16 = int_to_ptr.vmem [resolvable:$true] %s203_s16 }
  0x14   : > { %3478 = dma.hbm_to_vmem [thread:$0]  (!%p3815_p6), %s176_s24, 25088, %s178_s28, [#allocation6], %s3739_s13, %s3739_s13, %s3740_s14  }
  0x15   : > { %3481 = dma.hbm_to_vmem [thread:$0]  (!%p3815_p6), %s191_s6, 64, %s193_s12, [#allocation6]  }
  0x16   : > { %s3742_s17 = smov 64   ;;  %s3743_s22 = smov 4  }
  0x17   : > { %3484 = dma.hbm_to_vmem [thread:$0]  (!%p3815_p6), %s202_s10, 4096, %s204_s16, [#allocation9], %s3742_s17, %s3742_s17, %s3743_s22  }
  0x18   : > { %s2296_s23 = sadd.s32 4294967294, %s3735_s21   ;;  %s3830_s24 = sadd.s32 1, %s3735_s21  }
  0x19   : > { %s30_s27 = sadd.s32 1, %s3731_s20  ;;  %s27_s28 = ssub.s32 %s3735_s21, %s3830_s24 }
  0x1a   : > { %p37_p7 = scmp.ne.s32.totalorder %s3731_s20, %s3727_s19  ;;  %p28_p8 = scmp.eq.s32.totalorder %s27_s28, 0 }
  0x1b   : > { %p38_p9 = scmp.eq.s32.totalorder %s3735_s21, 0  ;;  %p43_p10 = scmp.ne.s32.totalorder %s3727_s19, %s3723_s18 }
  0x1c   : > { %p151_p11 = scmp.eq.s32.totalorder %s3798_s25, 1  ;;  %p157_p2 = scmp.eq.s32.totalorder %s2296_s23, 1 }
  0x1d   : > { %s3842_s29 = scalar_select %p28_p8, %s3731_s20, %s30_s27  }
  0x1e   : > { %p39_p12 = por %p38_p9, %p37_p7  ;;  %p3846_p13 = por %p44_p1, %p43_p10 }
  0x1f   : > { %p3850_p0 = por %p151_p11, %p37_p7  ;;  %p3496_p4 = scmp.lt.s32.totalorder %s3735_s21, 2 }
  0x20   : > { %s220_s7 = sand.u32 1, %s3731_s20   ;;  %p3856_p6 = por %p157_p2, %p43_p10 }
  0x21   : > { %s3456_s9 = smul.u32 56, %s220_s7  ;;  %p3860_p8 = pnand %p3496_p4, %p39_p12 }
  0x22   : > { %s3457_s11 = smul.u32 56, %s3735_s21  ;;  %s221_s22 = scalar_lea.sflag [#allocation3], %s220_s7 }
  0x23   : > { %s224_s15 = scalar_lea.vmem [#allocation2], %s3456_s9  ;;  %p3635_p9 = pneg %p3860_p8 }
  0x24   : > { %s229_s14 = scalar_lea.hbm %s4007_s0, %s3457_s11  ;;  %s233_s16 = sshll.u32 %s224_s15, 4  ;;  %s234_s16 = int_to_ptr.vmem [resolvable:$true] %s233_s16 }
  0x25   : > { %s231_s17 = sshll.u32 %s229_s14, 4  ;;  %s3638_s2 = scalar_lea.hbm %s4007_s0, 112  ;;  %s232_s17 = int_to_ptr.hbm [resolvable:$true] %s231_s17 }
  0x26   : > { %s3631_s23 = sshra.s32 %s232_s17, 4  ;;  %s3632_s23 = int_to_ptr.hbm [resolvable:$true] %s3631_s23 }
  0x27   : > { %s3633_s27 = scalar_lea.hbm %s3632_s23, 56  ;;  %p3639_p12 = scmp.lt.s32.totalorder %s3632_s23, %s4007_s0 }
  0x28   : > { %p3634_p7 = scmp.ne.s32.totalorder %s3632_s23, %s3633_s27  ;;  %p3640_p2 = scmp.lt.s32.totalorder %s3638_s2, %s3633_s27 }
  0x2a   : > { %p3636_p10 = pnand %p3635_p9, %p3634_p7  ;;  %p3641_p4 = por %p3640_p2, %p3639_p12 }
  0x2c   : > { %p3637_p11 = pneg %p3636_p10 }
  0x2e   : > { %p3642_p5 = pnand %p3641_p4, %p3637_p11 }
  0x30   : > { %3645 = shalt.err (!%p3642_p5)
}
  0x31   : > { %3488 = dma.hbm_to_vmem [thread:$0]  (!%p3860_p8), %s232_s17, 896, %s234_s16, %s221_s22  }
  0x32   : > { %242 = sbr.rel (%p3803_p3) target bundleno = 539 (0x21b), region = 40  ;;  %s3881_s7 = sand.u32 (!%p3803_p3), 1, %s3727_s19  }
  0x33   : > { %s3458_s1 = smul.u32 (!%p3803_p3), 56, %s3881_s7  ;;  %s245_s9 = scalar_lea.sflag (!%p3803_p3), [#allocation3], %s3881_s7 }
  0x35   : > { %s3885_s13 = scalar_lea.vmem (!%p3803_p3), [#allocation2], %s3458_s1 }
  0x37   : > { %3706 = dma.done.wait (%p3846_p13), %s245_s9, 896  }
  0x38   : > { %3708 = vsyncadd (%p3846_p13), %s245_s9, 4294966400 }
  0x39   : > { %3710 = dma.done.wait (%p44_p1), [#allocation6], 25152  }
  0x3a   : > { %3712 = vsyncadd (%p44_p1), [#allocation6], 4294942144 }
  0x3b   : > { %3714 = dma.done.wait (%p44_p1), [#allocation9], 4096  }
  0x3c   : > { %3716 = vsyncadd (%p44_p1), [#allocation9], 4294963200  ;;  %v2422_v0 = vld [vmem:[#allocation5 + $0xe0] sm:$0xf]  ;;  %v3258_v1 = vld [vmem:[#allocation5 + $0xec] sm:$0xf0] }
  0x3d   : > { %v2550_v2 = vld [vmem:[#allocation5 + $0x1e0] sm:$0xf]  ;;  %v2423_v3 = vor.u32 %v3258_v1, %v2422_v0  ;;  %v3290_v4 = vld [vmem:[#allocation5 + $0x1ec] sm:$0xf0]  ;;  %vm1492_vm0 = vcmask 130048   ;;  %s3225_s30 = sshll.u32 %s3798_s25, 3 }
  0x3e   : > { %v2678_v5 = vld [vmem:[#allocation5 + $0x2e0] sm:$0xf]  ;;  %v3322_v6 = vld [vmem:[#allocation5 + $0x2ec] sm:$0xf0]  ;;  %v2551_v7 = vor.u32 %v3290_v4, %v2550_v2  ;;  %s2307_s10 = sshll.u32 %s3881_s7, 3  ;;  %s2192_s16 = scalar_lea.hbm %s4012_s5, %s3225_s30 }
  0x3f   : > { %v2679_v8 = vor.u32 %v3322_v6, %v2678_v5  ;;  %v2806_v9 = vld [vmem:[#allocation5 + $0x3e0] sm:$0xf]  ;;  %v3354_v10 = vld [vmem:[#allocation5 + $0x3ec] sm:$0xf0]  ;;  %1496 = vmatpush.bf16.msra.mxu0 %v2423_v3  ;;  %s290_s17 = scalar_lea.vmem [#allocation10], %s2307_s10  ;;  %s2196_s23 = sshll.u32 %s2192_s16, 4  ;;  %s2197_s23 = int_to_ptr.hbm [resolvable:$true] %s2196_s23 }
  0x40   : > { %v2406_v11 = vld [vmem:[#allocation5 + $0xc0] sm:$0xf]  ;;  %v2807_v12 = vor.u32 %v3354_v10, %v2806_v9  ;;  %v3254_v13 = vld [vmem:[#allocation5 + $0xcc] sm:$0xf0]  ;;  %1509 = vmatpush.bf16.msra.mxu1 %v2551_v7  ;;  %s2194_s22 = sshll.u32 %s290_s17, 4  ;;  %s2182_s27 = scalar_lea.sflag [#allocation4], %s3881_s7  ;;  %s2195_s22 = int_to_ptr.vmem [resolvable:$true] %s2194_s22 }
  0x41   : > { %v2534_v14 = vld [vmem:[#allocation5 + $0x1c0] sm:$0xf]  ;;  %v3286_v15 = vld [vmem:[#allocation5 + $0x1cc] sm:$0xf0]  ;;  %1522 = vmatpush.bf16.msra.mxu2 %v2679_v8  ;;  %v2407_v16 = vor.u32 %v3254_v13, %v2406_v11  ;;  %s3675_s28 = sshra.s32 %s2197_s23, 4  ;;  %s3681_s1 = scalar_lea.hbm %s4012_s5, 16  ;;  %s3676_s28 = int_to_ptr.hbm [resolvable:$true] %s3675_s28 }
  0x42   : > { %v2535_v17 = vor.u32 %v3286_v15, %v2534_v14  ;;  %v2662_v18 = vld [vmem:[#allocation5 + $0x2c0] sm:$0xf]  ;;  %v3318_v19 = vld [vmem:[#allocation5 + $0x2cc] sm:$0xf0]  ;;  %1535 = vmatpush.bf16.msra.mxu3 %v2807_v12  ;;  %s3677_s12 = scalar_lea.hbm %s3676_s28, 8  ;;  %p3682_p13 = scmp.lt.s32.totalorder %s3676_s28, %s4012_s5 }
  0x43   : > { %v2790_v20 = vld [vmem:[#allocation5 + $0x3c0] sm:$0xf]  ;;  %v2663_v21 = vor.u32 %v3318_v19, %v2662_v18  ;;  %v3350_v22 = vld [vmem:[#allocation5 + $0x3cc] sm:$0xf0]  ;;  %1497 = vmatpush.bf16.msra.mxu0 %v2407_v16  ;;  %p3678_p1 = scmp.ne.s32.totalorder %s3676_s28, %s3677_s12  ;;  %p3683_p8 = scmp.lt.s32.totalorder %s3681_s1, %s3677_s12 }
  0x44   : > { %v2390_v23 = vld [vmem:[#allocation5 + $0xa0] sm:$0xf]  ;;  %v3250_v24 = vld [vmem:[#allocation5 + $0xac] sm:$0xf0]  ;;  %v2791_v25 = vor.u32 %v3350_v22, %v2790_v20  ;;  %1510 = vmatpush.bf16.msra.mxu1 %v2535_v17 }
  0x45   : > { %v2518_v26 = vld [vmem:[#allocation5 + $0x1a0] sm:$0xf]  ;;  %v3282_v27 = vld [vmem:[#allocation5 + $0x1ac] sm:$0xf0]  ;;  %v2391_v29 = vor.u32 %v3250_v24, %v2390_v23  ;;  %1523 = vmatpush.bf16.msra.mxu2 %v2663_v21  ;;  %p3679_p3 = pnand %p3678_p1, %p3850_p0  ;;  %p3684_p7 = por %p3683_p8, %p3682_p13 }
  0x46   : > { %v2646_v28 = vld [vmem:[#allocation5 + $0x2a0] sm:$0xf]  ;;  %v3314_v30 = vld [vmem:[#allocation5 + $0x2ac] sm:$0xf0]  ;;  %v2519_v33 = vor.u32 %v3282_v27, %v2518_v26  ;;  %1536 = vmatpush.bf16.msra.mxu3 %v2791_v25 }
  0x47   : > { %v2774_v31 = vld [vmem:[#allocation5 + $0x3a0] sm:$0xf]  ;;  %v3346_v32 = vld [vmem:[#allocation5 + $0x3ac] sm:$0xf0]  ;;  %v2647_v34 = vor.u32 %v3314_v30, %v2646_v28  ;;  %1498 = vmatpush.bf16.msra.mxu0 %v2391_v29  ;;  %p3680_p5 = pneg %p3679_p3 }
  0x48   : > { %v2374_v35 = vld [vmem:[#allocation5 + $0x80] sm:$0xf]  ;;  %v3246_v36 = vld [vmem:[#allocation5 + $0x8c] sm:$0xf0]  ;;  %v2775_v38 = vor.u32 %v3346_v32, %v2774_v31  ;;  %1511 = vmatpush.bf16.msra.mxu1 %v2519_v33  ;;  %v3256_v33 = vld [vmem:[#allocation5 + $0xe4] sm:$0xf] }
  0x49   : > { %v2502_v37 = vld [vmem:[#allocation5 + $0x180] sm:$0xf]  ;;  %v3278_v39 = vld [vmem:[#allocation5 + $0x18c] sm:$0xf0]  ;;  %v2375_v44 = vor.u32 %v3246_v36, %v2374_v35  ;;  %1524 = vmatpush.bf16.msra.mxu2 %v2647_v34  ;;  %v2424_v34 = vld [vmem:[#allocation5 + $0xf0] sm:$0xf0]  ;;  %p3685_p9 = pnand %p3684_p7, %p3680_p5 }
  0x4a   : > { %v2630_v40 = vld [vmem:[#allocation5 + $0x280] sm:$0xf]  ;;  %v3310_v41 = vld [vmem:[#allocation5 + $0x28c] sm:$0xf0]  ;;  %v2503_v45 = vor.u32 %v3278_v39, %v2502_v37  ;;  %1537 = vmatpush.bf16.msra.mxu3 %v2775_v38 }
  0x4b   : > { %v2758_v42 = vld [vmem:[#allocation5 + $0x380] sm:$0xf]  ;;  %v3342_v43 = vld [vmem:[#allocation5 + $0x38c] sm:$0xf0]  ;;  %v2631_v46 = vor.u32 %v3310_v41, %v2630_v40  ;;  %1499 = vmatpush.bf16.msra.mxu0 %v2375_v44  ;;  %v2552_v44 = vld [vmem:[#allocation5 + $0x1f0] sm:$0xf0] }
  0x4c   : > { %v2358_v47 = vld [vmem:[#allocation5 + $0x60] sm:$0xf]  ;;  %v3242_v48 = vld [vmem:[#allocation5 + $0x6c] sm:$0xf0]  ;;  %v2759_v50 = vor.u32 %v3342_v43, %v2758_v42  ;;  %1512 = vmatpush.bf16.msra.mxu1 %v2503_v45  ;;  %v3288_v43 = vld [vmem:[#allocation5 + $0x1e4] sm:$0xf] }
  0x4d   : > { %v2486_v49 = vld [vmem:[#allocation5 + $0x160] sm:$0xf]  ;;  %v3274_v51 = vld [vmem:[#allocation5 + $0x16c] sm:$0xf0]  ;;  %v2359_v56 = vor.u32 %v3242_v48, %v2358_v47  ;;  %1525 = vmatpush.bf16.msra.mxu2 %v2631_v46  ;;  %v2427_v47 = vor.u32 %v3256_v33, %v2424_v34 }
  0x4e   : > { %v2614_v52 = vld [vmem:[#allocation5 + $0x260] sm:$0xf]  ;;  %v3306_v53 = vld [vmem:[#allocation5 + $0x26c] sm:$0xf0]  ;;  %v2487_v57 = vor.u32 %v3274_v51, %v2486_v49  ;;  %1538 = vmatpush.bf16.msra.mxu3 %v2759_v50 }
  0x4f   : > { %v2742_v54 = vld [vmem:[#allocation5 + $0x360] sm:$0xf]  ;;  %v3338_v55 = vld [vmem:[#allocation5 + $0x36c] sm:$0xf0]  ;;  %v2615_v58 = vor.u32 %v3306_v53, %v2614_v52  ;;  %1500 = vmatpush.bf16.msra.mxu0 %v2359_v56  ;;  %v3252_v53 = vld [vmem:[#allocation5 + $0xc4] sm:$0xf] }
  0x50   : > { %v2342_v59 = vld [vmem:[#allocation5 + $0x40] sm:$0xf]  ;;  %v3238_v60 = vld [vmem:[#allocation5 + $0x4c] sm:$0xf0]  ;;  %v2743_v62 = vor.u32 %v3338_v55, %v2742_v54  ;;  %1513 = vmatpush.bf16.msra.mxu1 %v2487_v57  ;;  %v2408_v54 = vld [vmem:[#allocation5 + $0xd0] sm:$0xf0] }
  0x51   : > { %v2470_v61 = vld [vmem:[#allocation5 + $0x140] sm:$0xf]  ;;  %v3270_v63 = vld [vmem:[#allocation5 + $0x14c] sm:$0xf0]  ;;  %v2343_v4 = vor.u32 %v3238_v60, %v2342_v59  ;;  %1526 = vmatpush.bf16.msra.mxu2 %v2615_v58  ;;  %v2555_v59 = vor.u32 %v3288_v43, %v2552_v44  ;;  %v3236_v43 = vld [vmem:[#allocation5 + $0x44] sm:$0xf] }
  0x52   : > { %v2598_v0 = vld [vmem:[#allocation5 + $0x240] sm:$0xf]  ;;  %v3302_v1 = vld [vmem:[#allocation5 + $0x24c] sm:$0xf0]  ;;  %v2471_v5 = vor.u32 %v3270_v63, %v2470_v61  ;;  %1539 = vmatpush.bf16.msra.mxu3 %v2743_v62  ;;  %v3284_v61 = vld [vmem:[#allocation5 + $0x1c4] sm:$0xf] }
  0x53   : > { %v2726_v2 = vld [vmem:[#allocation5 + $0x340] sm:$0xf]  ;;  %v3334_v3 = vld [vmem:[#allocation5 + $0x34c] sm:$0xf0]  ;;  %v2599_v6 = vor.u32 %v3302_v1, %v2598_v0  ;;  %1501 = vmatpush.bf16.msra.mxu0 %v2343_v4  ;;  %v2536_v62 = vld [vmem:[#allocation5 + $0x1d0] sm:$0xf0]  ;;  %v2411_v0 = vor.u32 %v3252_v53, %v2408_v54 }
  0x54   : > { %v2326_v7 = vld [vmem:[#allocation5 + $0x20] sm:$0xf]  ;;  %v3234_v8 = vld [vmem:[#allocation5 + $0x2c] sm:$0xf0]  ;;  %v2727_v10 = vor.u32 %v3334_v3, %v2726_v2  ;;  %1514 = vmatpush.bf16.msra.mxu1 %v2471_v5  ;;  %v3248_v5 = vld [vmem:[#allocation5 + $0xa4] sm:$0xf] }
  0x55   : > { %v2454_v9 = vld [vmem:[#allocation5 + $0x120] sm:$0xf]  ;;  %v3266_v11 = vld [vmem:[#allocation5 + $0x12c] sm:$0xf0]  ;;  %v2327_v16 = vor.u32 %v3234_v8, %v2326_v7  ;;  %1527 = vmatpush.bf16.msra.mxu2 %v2599_v6  ;;  %v2392_v6 = vld [vmem:[#allocation5 + $0xb0] sm:$0xf0]  ;;  %v2539_v8 = vor.u32 %v3284_v61, %v2536_v62 }
  0x56   : > { %v2582_v12 = vld [vmem:[#allocation5 + $0x220] sm:$0xf]  ;;  %v3298_v13 = vld [vmem:[#allocation5 + $0x22c] sm:$0xf0]  ;;  %v2455_v20 = vor.u32 %v3266_v11, %v2454_v9  ;;  %1540 = vmatpush.bf16.msra.mxu3 %v2727_v10  ;;  %v3280_v10 = vld [vmem:[#allocation5 + $0x1a4] sm:$0xf] }
  0x57   : > { %v2710_v14 = vld [vmem:[#allocation5 + $0x320] sm:$0xf]  ;;  %v3330_v15 = vld [vmem:[#allocation5 + $0x32c] sm:$0xf0]  ;;  %v2583_v21 = vor.u32 %v3298_v13, %v2582_v12  ;;  %1502 = vmatpush.bf16.msra.mxu0 %v2327_v16  ;;  %v2520_v11 = vld [vmem:[#allocation5 + $0x1b0] sm:$0xf0]  ;;  %v2395_v13 = vor.u32 %v3248_v5, %v2392_v6 }
  0x58   : > { %v2310_v17 = vld [vmem:[#allocation5] sm:$0xf]  ;;  %v3230_v18 = vld [vmem:[#allocation5 + $0xc] sm:$0xf0]  ;;  %v2711_v25 = vor.u32 %v3330_v15, %v2710_v14  ;;  %1515 = vmatpush.bf16.msra.mxu1 %v2455_v20  ;;  %v2523_v20 = vor.u32 %v3280_v10, %v2520_v11  ;;  %v2344_v44 = vld [vmem:[#allocation5 + $0x50] sm:$0xf0] }
  0x59   : > { %v2438_v19 = vld [vmem:[#allocation5 + $0x100] sm:$0xf]  ;;  %v3262_v22 = vld [vmem:[#allocation5 + $0x10c] sm:$0xf0]  ;;  %v2311_v32 = vor.u32 %v3230_v18, %v2310_v17  ;;  %1528 = vmatpush.bf16.msra.mxu2 %v2583_v21  ;;  %v3244_v18 = vld [vmem:[#allocation5 + $0x84] sm:$0xf] }
  0x5a   : > { %v2566_v23 = vld [vmem:[#allocation5 + $0x200] sm:$0xf]  ;;  %v3294_v24 = vld [vmem:[#allocation5 + $0x20c] sm:$0xf0]  ;;  %v2439_v36 = vor.u32 %v3262_v22, %v2438_v19  ;;  %1541 = vmatpush.bf16.msra.mxu3 %v2711_v25  ;;  %v2376_v19 = vld [vmem:[#allocation5 + $0x90] sm:$0xf0] }
  0x5b   : > { %v2694_v26 = vld [vmem:[#allocation5 + $0x300] sm:$0xf]  ;;  %v3326_v27 = vld [vmem:[#allocation5 + $0x30c] sm:$0xf0]  ;;  %v2567_v37 = vor.u32 %v3294_v24, %v2566_v23  ;;  %1503 = vmatpush.bf16.msra.mxu0 %v2311_v32  ;;  %v3276_v22 = vld [vmem:[#allocation5 + $0x184] sm:$0xf]  ;;  %v2379_v25 = vor.u32 %v3244_v18, %v2376_v19 }
  0x5c   : > { %v2934_v28 = vld [vmem:[#allocation5 + $0x4e0] sm:$0xf]  ;;  %v3386_v29 = vld [vmem:[#allocation5 + $0x4ec] sm:$0xf0]  ;;  %v2695_v41 = vor.u32 %v3326_v27, %v2694_v26  ;;  %1516 = vmatpush.bf16.msra.mxu1 %v2439_v36  ;;  %v2504_v23 = vld [vmem:[#allocation5 + $0x190] sm:$0xf0] }
  0x5d   : > { %v3062_v30 = vld [vmem:[#allocation5 + $0x5e0] sm:$0xf]  ;;  %v3418_v31 = vld [vmem:[#allocation5 + $0x5ec] sm:$0xf0]  ;;  %v2935_v42 = vor.u32 %v3386_v29, %v2934_v28  ;;  %1529 = vmatpush.bf16.msra.mxu2 %v2567_v37  ;;  %v2507_v33 = vor.u32 %v3276_v22, %v2504_v23  ;;  %v2488_v36 = vld [vmem:[#allocation5 + $0x170] sm:$0xf0] }
  0x5e   : > { %v294_v35 = vld [vmem:[%s3885_s13 + $0x10] sm:$0xff]  ;;  %v3422_v39 = vld [vmem:[#allocation5 + $0x60c] sm:$0xf0]  ;;  %v295_v45 = vld [vmem:[%s3885_s13 + $0x18] sm:$0xff]  ;;  %v3063_v46 = vor.u32 %v3418_v31, %v3062_v30  ;;  %1542 = vmatpush.bf16.msra.mxu3 %v2695_v41 }
  0x5f   : > { %v3078_v38 = vld [vmem:[#allocation5 + $0x600] sm:$0xf]  ;;  %v292_v40 = vld [vmem:[%s3885_s13] sm:$0xff]  ;;  %v3902_v51 = vpack.c.bf16 %v294_v35, %v294_v35  ;;  %v3906_v57 = vpack.c.bf16 %v295_v45, %v295_v45  ;;  %v293_v58 = vld [vmem:[%s3885_s13 + $0x8] sm:$0xff]  ;;  %1548 = vmatpush.bf16.msrb.mxu0 %v2935_v42 }
  0x60   : > { %v2918_v48 = vld [vmem:[#allocation5 + $0x4c0] sm:$0xf]  ;;  %v3382_v49 = vld [vmem:[#allocation5 + $0x4cc] sm:$0xf0]  ;;  %v3904_v55 = vpack.c.bf16 %v292_v40, %v292_v40  ;;  %v3079_v56 = vor.u32 %v3422_v39, %v3078_v38  ;;  %1561 = vmatpush.bf16.msrb.mxu1 %v3063_v46  ;;  %v3911_v7 = vpack.c.bf16 %v293_v58, %v293_v58  ;;  %v3240_v30 = vld [vmem:[#allocation5 + $0x64] sm:$0xf] }
  0x61   : > { %v3046_v50 = vld [vmem:[#allocation5 + $0x5c0] sm:$0xf]  ;;  %v3414_v52 = vld [vmem:[#allocation5 + $0x5cc] sm:$0xf0]  ;;  %v2919_v60 = vor.u32 %v3382_v49, %v2918_v48  ;;  %1530 = vmatmul.bf16.vlgmr.msra.gmra.mxu2 %v3902_v51  ;;  %1543 = vmatmul.bf16.vlgmr.msra.gmra.mxu3 %v3906_v57  ;;  %v2360_v31 = vld [vmem:[#allocation5 + $0x70] sm:$0xf0] }
  0x62   : > { %1587 = vmatpush.bf16.msrb.mxu3 %v2427_v47  ;;  %v3047_v63 = vor.u32 %v3414_v52, %v3046_v50  ;;  %v2902_v1 = vld [vmem:[#allocation5 + $0x4a0] sm:$0xf]  ;;  %v3378_v2 = vld [vmem:[#allocation5 + $0x4ac] sm:$0xf0]  ;;  %1504 = vmatmul.bf16.vlgmr.msra.gmra.mxu0 %v3904_v55  ;;  %v3272_v35 = vld [vmem:[#allocation5 + $0x164] sm:$0xf]  ;;  %v2363_v38 = vor.u32 %v3240_v30, %v2360_v31  ;;  %v2347_v52 = vor.u32 %v3236_v43, %v2344_v44 }
  0x63   : > { %v3030_v3 = vld [vmem:[#allocation5 + $0x5a0] sm:$0xf]  ;;  %v3410_v4 = vld [vmem:[#allocation5 + $0x5ac] sm:$0xf0]  ;;  %1581 = vmatpush.bf16.msrb.mxu2 %v3079_v56  ;;  %1549 = vmatpush.bf16.msrb.mxu0 %v2919_v60  ;;  %v2903_v9 = vor.u32 %v3378_v2, %v2902_v1  ;;  %v2491_v46 = vor.u32 %v3272_v35, %v2488_v36  ;;  %v3268_v48 = vld [vmem:[#allocation5 + $0x144] sm:$0xf] }
  0x64   : > { %1562 = vmatpush.bf16.msrb.mxu1 %v3047_v63  ;;  %v3031_v12 = vor.u32 %v3410_v4, %v3030_v3  ;;  %v2886_v14 = vld [vmem:[#allocation5 + $0x480] sm:$0xf]  ;;  %v3374_v15 = vld [vmem:[#allocation5 + $0x48c] sm:$0xf0]  ;;  %v2472_v49 = vld [vmem:[#allocation5 + $0x150] sm:$0xf0] }
  0x65   : > { %v3014_v16 = vld [vmem:[#allocation5 + $0x580] sm:$0xf]  ;;  %1517 = vmatmul.bf16.vlgmr.msra.gmra.mxu1 %v3911_v7  ;;  %v3406_v17 = vld [vmem:[#allocation5 + $0x58c] sm:$0xf0]  ;;  %v2887_v21 = vor.u32 %v3374_v15, %v2886_v14  ;;  %v2328_v60 = vld [vmem:[#allocation5 + $0x30] sm:$0xf0]  ;;  %v2475_v61 = vor.u32 %v3268_v48, %v2472_v49 }
  0x66   : > { %1588 = vmatpush.bf16.msrb.mxu3 %v2411_v0  ;;  %v3015_v24 = vor.u32 %v3406_v17, %v3014_v16  ;;  %v2870_v26 = vld [vmem:[#allocation5 + $0x460] sm:$0xf]  ;;  %v3370_v27 = vld [vmem:[#allocation5 + $0x46c] sm:$0xf0]  ;;  %v3264_v63 = vld [vmem:[#allocation5 + $0x124] sm:$0xf] }
  0x67   : > { %1600 = vmatpush.bf16.msra.mxu2 %v2555_v59  ;;  %1550 = vmatpush.bf16.msrb.mxu0 %v2903_v9  ;;  %v2998_v28 = vld [vmem:[#allocation5 + $0x560] sm:$0xf]  ;;  %v3402_v29 = vld [vmem:[#allocation5 + $0x56c] sm:$0xf0]  ;;  %v2871_v34 = vor.u32 %v3370_v27, %v2870_v26  ;;  %v3232_v59 = vld [vmem:[#allocation5 + $0x24] sm:$0xf] }
  0x68   : > { %1563 = vmatpush.bf16.msrb.mxu1 %v3031_v12  ;;  %v298_v32 = vld [vmem:[%s3885_s13 + $0x30] sm:$0xff]  ;;  %v2999_v37 = vor.u32 %v3402_v29, %v2998_v28  ;;  %v3366_v40 = vld [vmem:[#allocation5 + $0x44c] sm:$0xf0]  ;;  %v2456_v0 = vld [vmem:[#allocation5 + $0x130] sm:$0xf0]  ;;  %v2331_v3 = vor.u32 %v3232_v59, %v2328_v60 }
  0x69   : > { %v2854_v39 = vld [vmem:[#allocation5 + $0x440] sm:$0xf]  ;;  %v3398_v42 = vld [vmem:[#allocation5 + $0x54c] sm:$0xf0]  ;;  %v3916_v45 = vpack.c.bf16 %v298_v32, %v298_v32  ;;  %v2312_v9 = vld [vmem:[#allocation5 + $0x10] sm:$0xf0]  ;;  %v2459_v14 = vor.u32 %v3264_v63, %v2456_v0 }
  0x6a   : > { %1589 = vmatpush.bf16.msrb.mxu3 %v2395_v13  ;;  %v2982_v41 = vld [vmem:[#allocation5 + $0x540] sm:$0xf]  ;;  %v2855_v47 = vor.u32 %v3366_v40, %v2854_v39  ;;  %v3362_v54 = vld [vmem:[#allocation5 + $0x42c] sm:$0xf0]  ;;  %v3320_v10 = vld [vmem:[#allocation5 + $0x2e4] sm:$0xf] }
  0x6b   : > { %1601 = vmatpush.bf16.msra.mxu2 %v2539_v8  ;;  %1551 = vmatpush.bf16.msrb.mxu0 %v2887_v21  ;;  %v2983_v50 = vor.u32 %v3398_v42, %v2982_v41  ;;  %v2838_v53 = vld [vmem:[#allocation5 + $0x420] sm:$0xf]  ;;  %v3394_v58 = vld [vmem:[#allocation5 + $0x52c] sm:$0xf0]  ;;  %v3228_v8 = vld [vmem:[#allocation5 + $0x4] sm:$0xf] }
  0x6c   : > { %1564 = vmatpush.bf16.msrb.mxu1 %v3015_v24  ;;  %v2966_v56 = vld [vmem:[#allocation5 + $0x520] sm:$0xf]  ;;  %v2839_v62 = vor.u32 %v3362_v54, %v2838_v53  ;;  %v3358_v4 = vld [vmem:[#allocation5 + $0x40c] sm:$0xf0]  ;;  %v2680_v11 = vld [vmem:[#allocation5 + $0x2f0] sm:$0xf0] }
  0x6d   : > { %v2822_v1 = vld [vmem:[#allocation5 + $0x400] sm:$0xf]  ;;  %v2967_v2 = vor.u32 %v3394_v58, %v2966_v56  ;;  %v3390_v6 = vld [vmem:[#allocation5 + $0x50c] sm:$0xf0]  ;;  %v3352_v12 = vld [vmem:[#allocation5 + $0x3e4] sm:$0xf]  ;;  %v2683_v24 = vor.u32 %v3320_v10, %v2680_v11 }
  0x6e   : > { %1590 = vmatpush.bf16.msrb.mxu3 %v2379_v25  ;;  %v2950_v5 = vld [vmem:[#allocation5 + $0x500] sm:$0xf]  ;;  %v2808_v13 = vld [vmem:[#allocation5 + $0x3f0] sm:$0xf0]  ;;  %v2823_v15 = vor.u32 %v3358_v4, %v2822_v1  ;;  %v3384_v16 = vld [vmem:[#allocation5 + $0x4e4] sm:$0xf] }
  0x6f   : > { %1602 = vmatpush.bf16.msra.mxu2 %v2523_v20  ;;  %1552 = vmatpush.bf16.msrb.mxu0 %v2871_v34  ;;  %v2936_v17 = vld [vmem:[#allocation5 + $0x4f0] sm:$0xf0]  ;;  %v2951_v19 = vor.u32 %v3390_v6, %v2950_v5  ;;  %v2315_v20 = vor.u32 %v3228_v8, %v2312_v9  ;;  %v3260_v21 = vld [vmem:[#allocation5 + $0x104] sm:$0xf]  ;;  %v2811_v25 = vor.u32 %v3352_v12, %v2808_v13 }
  0x70   : > { %1565 = vmatpush.bf16.msrb.mxu1 %v2999_v37  ;;  %v296_v18 = vld [vmem:[%s3885_s13 + $0x20] sm:$0xff]  ;;  %v297_v23 = vld [vmem:[%s3885_s13 + $0x28] sm:$0xff]  ;;  %v3416_v26 = vld [vmem:[#allocation5 + $0x5e4] sm:$0xf]  ;;  %v2939_v29 = vor.u32 %v3384_v16, %v2936_v17 }
  0x71   : > { %3092 = vmatmul.msk.bf16.vlgmr.msrb.gmra.mxu2 %vm1492_vm0, %v3916_v45  ;;  %v2440_v22 = vld [vmem:[#allocation5 + $0x110] sm:$0xf0]  ;;  %v3316_v28 = vld [vmem:[#allocation5 + $0x2c4] sm:$0xf]  ;;  %v3922_v30 = vpack.c.bf16 %v296_v18, %v296_v18  ;;  %v3924_v35 = vpack.c.bf16 %v297_v23, %v297_v23 }
  0x72   : > { %1591 = vmatpush.bf16.msrb.mxu3 %v2363_v38  ;;  %v3064_v27 = vld [vmem:[#allocation5 + $0x5f0] sm:$0xf0]  ;;  %v3348_v32 = vld [vmem:[#allocation5 + $0x3c4] sm:$0xf]  ;;  %v2443_v34 = vor.u32 %v3260_v21, %v2440_v22 }
  0x73   : > { %1603 = vmatpush.bf16.msra.mxu2 %v2507_v33  ;;  %1553 = vmatpush.bf16.msrb.mxu0 %v2855_v47  ;;  %v2664_v31 = vld [vmem:[#allocation5 + $0x2d0] sm:$0xf0]  ;;  %v3380_v36 = vld [vmem:[#allocation5 + $0x4c4] sm:$0xf]  ;;  %v3067_v38 = vor.u32 %v3416_v26, %v3064_v27 }
  0x74   : > { %1566 = vmatpush.bf16.msrb.mxu1 %v2983_v50  ;;  %v2792_v33 = vld [vmem:[#allocation5 + $0x3d0] sm:$0xf0]  ;;  %v2667_v39 = vor.u32 %v3316_v28, %v2664_v31  ;;  %v3412_v41 = vld [vmem:[#allocation5 + $0x5c4] sm:$0xf] }
  0x75   : > { %v2920_v37 = vld [vmem:[#allocation5 + $0x4d0] sm:$0xf0]  ;;  %v2795_v40 = vor.u32 %v3348_v32, %v2792_v33  ;;  %v3312_v43 = vld [vmem:[#allocation5 + $0x2a4] sm:$0xf] }
  0x76   : > { %1592 = vmatpush.bf16.msrb.mxu3 %v2347_v52  ;;  %v3048_v42 = vld [vmem:[#allocation5 + $0x5d0] sm:$0xf0]  ;;  %v2923_v44 = vor.u32 %v3380_v36, %v2920_v37  ;;  %v3344_v47 = vld [vmem:[#allocation5 + $0x3a4] sm:$0xf] }
  0x77   : > { %1604 = vmatpush.bf16.msra.mxu2 %v2491_v46  ;;  %1554 = vmatpush.bf16.msrb.mxu0 %v2839_v62  ;;  %v2648_v46 = vld [vmem:[#allocation5 + $0x2b0] sm:$0xf0]  ;;  %v3376_v49 = vld [vmem:[#allocation5 + $0x4a4] sm:$0xf]  ;;  %v3051_v52 = vor.u32 %v3412_v41, %v3048_v42 }
  0x78   : > { %1567 = vmatpush.bf16.msrb.mxu1 %v2967_v2  ;;  %v2776_v48 = vld [vmem:[#allocation5 + $0x3b0] sm:$0xf0]  ;;  %v2651_v53 = vor.u32 %v3312_v43, %v2648_v46  ;;  %v3408_v56 = vld [vmem:[#allocation5 + $0x5a4] sm:$0xf] }
  0x79   : > { %v2904_v50 = vld [vmem:[#allocation5 + $0x4b0] sm:$0xf0]  ;;  %v2779_v54 = vor.u32 %v3344_v47, %v2776_v48  ;;  %v3308_v59 = vld [vmem:[#allocation5 + $0x284] sm:$0xf] }
  0x7a   : > { %1593 = vmatpush.bf16.msrb.mxu3 %v2331_v3  ;;  %v3032_v58 = vld [vmem:[#allocation5 + $0x5b0] sm:$0xf0]  ;;  %v2907_v60 = vor.u32 %v3376_v49, %v2904_v50  ;;  %v3340_v62 = vld [vmem:[#allocation5 + $0x384] sm:$0xf] }
  0x7b   : > { %1605 = vmatpush.bf16.msra.mxu2 %v2475_v61  ;;  %1555 = vmatpush.bf16.msrb.mxu0 %v2823_v15  ;;  %v2632_v61 = vld [vmem:[#allocation5 + $0x290] sm:$0xf0]  ;;  %v3372_v0 = vld [vmem:[#allocation5 + $0x484] sm:$0xf]  ;;  %v3035_v2 = vor.u32 %v3408_v56, %v3032_v58  ;;  %v2430_v56 = vld [vmem:[#allocation5 + $0xe8] sm:$0xf] }
  0x7c   : > { %1568 = vmatpush.bf16.msrb.mxu1 %v2951_v19  ;;  %v2760_v63 = vld [vmem:[#allocation5 + $0x390] sm:$0xf0]  ;;  %v2635_v3 = vor.u32 %v3308_v59, %v2632_v61  ;;  %v3404_v5 = vld [vmem:[#allocation5 + $0x584] sm:$0xf]  ;;  %v3259_v58 = vld [vmem:[#allocation5 + $0xf4] sm:$0xf0] }
  0x7d   : > { %v2888_v1 = vld [vmem:[#allocation5 + $0x490] sm:$0xf0]  ;;  %v2763_v4 = vor.u32 %v3340_v62, %v2760_v63  ;;  %v3304_v8 = vld [vmem:[#allocation5 + $0x264] sm:$0xf]  ;;  %v2686_v62 = vld [vmem:[#allocation5 + $0x2e8] sm:$0xf] }
  0x7e   : > { %1594 = vmatpush.bf16.msrb.mxu3 %v2315_v20  ;;  %1556 = vmatmul.bf16.vlgmr.msrb.gmra.mxu0 %v3922_v30  ;;  %v3016_v6 = vld [vmem:[#allocation5 + $0x590] sm:$0xf0]  ;;  %v2891_v9 = vor.u32 %v3372_v0, %v2888_v1  ;;  %v3336_v11 = vld [vmem:[#allocation5 + $0x364] sm:$0xf]  ;;  %v3323_v63 = vld [vmem:[#allocation5 + $0x2f4] sm:$0xf0] }
  0x7f   : > { %1606 = vmatpush.bf16.msra.mxu2 %v2459_v14  ;;  %1613 = vmatpush.bf16.msra.mxu0 %v2683_v24  ;;  %v2616_v10 = vld [vmem:[#allocation5 + $0x270] sm:$0xf0]  ;;  %v3368_v13 = vld [vmem:[#allocation5 + $0x464] sm:$0xf]  ;;  %v3019_v15 = vor.u32 %v3404_v5, %v3016_v6  ;;  %v2431_v5 = vor.u32 %v3259_v58, %v2430_v56  ;;  %v2814_v6 = vld [vmem:[#allocation5 + $0x3e8] sm:$0xf] }
  0x80   : > { %1626 = vmatpush.bf16.msra.mxu1 %v2811_v25  ;;  %v2744_v12 = vld [vmem:[#allocation5 + $0x370] sm:$0xf0]  ;;  %v2619_v16 = vor.u32 %v3304_v8, %v2616_v10  ;;  %v3400_v18 = vld [vmem:[#allocation5 + $0x564] sm:$0xf]  ;;  %v3355_v8 = vld [vmem:[#allocation5 + $0x3f4] sm:$0xf0] }
  0x81   : > { %1569 = vmatmul.bf16.vlgmr.msrb.gmra.mxu1 %v3924_v35  ;;  %1595 = vmatmul.bf16.vlgmr.msrb.gmra.mxu3 %v3904_v55  ;;  %v2872_v14 = vld [vmem:[#allocation5 + $0x470] sm:$0xf0]  ;;  %v2747_v17 = vor.u32 %v3336_v11, %v2744_v12  ;;  %v3300_v20 = vld [vmem:[#allocation5 + $0x244] sm:$0xf]  ;;  %v2558_v10 = vld [vmem:[#allocation5 + $0x1e8] sm:$0xf]  ;;  %v2687_v12 = vor.u32 %v3323_v63, %v2686_v62 }
  0x82   : > { %1639 = vmatpush.bf16.msra.mxu3 %v2939_v29  ;;  %v3000_v19 = vld [vmem:[#allocation5 + $0x570] sm:$0xf0]  ;;  %v2875_v21 = vor.u32 %v3368_v13, %v2872_v14  ;;  %v3332_v23 = vld [vmem:[#allocation5 + $0x344] sm:$0xf]  ;;  %v3291_v11 = vld [vmem:[#allocation5 + $0x1f4] sm:$0xf0] }
  0x83   : > { %1607 = vmatpush.bf16.msra.mxu2 %v2443_v34  ;;  %1614 = vmatpush.bf16.msra.mxu0 %v2667_v39  ;;  %v2600_v22 = vld [vmem:[#allocation5 + $0x250] sm:$0xf0]  ;;  %v3364_v25 = vld [vmem:[#allocation5 + $0x444] sm:$0xf]  ;;  %v3003_v27 = vor.u32 %v3400_v18, %v3000_v19  ;;  %v2414_v14 = vld [vmem:[#allocation5 + $0xc8] sm:$0xf]  ;;  %v2559_v19 = vor.u32 %v3291_v11, %v2558_v10 }
  0x84   : > { %1627 = vmatpush.bf16.msra.mxu1 %v2795_v40  ;;  %v2728_v24 = vld [vmem:[#allocation5 + $0x350] sm:$0xf0]  ;;  %v2603_v28 = vor.u32 %v3300_v20, %v2600_v22  ;;  %v3396_v31 = vld [vmem:[#allocation5 + $0x544] sm:$0xf]  ;;  %v3319_v18 = vld [vmem:[#allocation5 + $0x2d4] sm:$0xf0] }
  0x85   : > { %v2856_v26 = vld [vmem:[#allocation5 + $0x450] sm:$0xf0]  ;;  %v2731_v29 = vor.u32 %v3332_v23, %v2728_v24  ;;  %v3296_v33 = vld [vmem:[#allocation5 + $0x224] sm:$0xf]  ;;  %v2798_v20 = vld [vmem:[#allocation5 + $0x3c8] sm:$0xf] }
  0x86   : > { %1640 = vmatpush.bf16.msra.mxu3 %v2923_v44  ;;  %1608 = vmatmul.bf16.vlgmr.msra.gmra.mxu2 %v3911_v7  ;;  %v2984_v32 = vld [vmem:[#allocation5 + $0x550] sm:$0xf0]  ;;  %v2859_v34 = vor.u32 %v3364_v25, %v2856_v26  ;;  %v3328_v37 = vld [vmem:[#allocation5 + $0x324] sm:$0xf]  ;;  %v2542_v23 = vld [vmem:[#allocation5 + $0x1c8] sm:$0xf] }
  0x87   : > { %1652 = vmatpush.bf16.msrb.mxu2 %v3067_v38  ;;  %1615 = vmatpush.bf16.msra.mxu0 %v2651_v53  ;;  %v2584_v36 = vld [vmem:[#allocation5 + $0x230] sm:$0xf0]  ;;  %v3360_v39 = vld [vmem:[#allocation5 + $0x424] sm:$0xf]  ;;  %v2987_v41 = vor.u32 %v3396_v31, %v2984_v32  ;;  %v3287_v24 = vld [vmem:[#allocation5 + $0x1d4] sm:$0xf0] }
  0x88   : > { %1628 = vmatpush.bf16.msra.mxu1 %v2779_v54  ;;  %v2712_v38 = vld [vmem:[#allocation5 + $0x330] sm:$0xf0]  ;;  %v3392_v42 = vld [vmem:[#allocation5 + $0x524] sm:$0xf]  ;;  %v2587_v46 = vor.u32 %v3296_v33, %v2584_v36  ;;  %v2398_v26 = vld [vmem:[#allocation5 + $0xa8] sm:$0xf]  ;;  %v2543_v32 = vor.u32 %v3287_v24, %v2542_v23 }
  0x89   : > { %v2840_v40 = vld [vmem:[#allocation5 + $0x430] sm:$0xf0]  ;;  %v3292_v44 = vld [vmem:[#allocation5 + $0x204] sm:$0xf]  ;;  %v2715_v47 = vor.u32 %v3328_v37, %v2712_v38  ;;  %v3315_v31 = vld [vmem:[#allocation5 + $0x2b4] sm:$0xf0] }
  0x8a   : > { %1641 = vmatpush.bf16.msra.mxu3 %v2907_v60  ;;  %v2968_v43 = vld [vmem:[#allocation5 + $0x530] sm:$0xf0]  ;;  %v3324_v49 = vld [vmem:[#allocation5 + $0x304] sm:$0xf]  ;;  %v2782_v33 = vld [vmem:[#allocation5 + $0x3a8] sm:$0xf] }
  0x8b   : > { %1653 = vmatpush.bf16.msrb.mxu2 %v3051_v52  ;;  %1616 = vmatpush.bf16.msra.mxu0 %v2635_v3  ;;  %v2568_v48 = vld [vmem:[#allocation5 + $0x210] sm:$0xf0]  ;;  %v2843_v52 = vor.u32 %v3360_v39, %v2840_v40  ;;  %v3356_v53 = vld [vmem:[#allocation5 + $0x404] sm:$0xf]  ;;  %v2971_v60 = vor.u32 %v3392_v42, %v2968_v43  ;;  %v2526_v37 = vld [vmem:[#allocation5 + $0x1a8] sm:$0xf] }
  0x8c   : > { %1629 = vmatpush.bf16.msra.mxu1 %v2763_v4  ;;  %v2696_v50 = vld [vmem:[#allocation5 + $0x310] sm:$0xf0]  ;;  %v3420_v59 = vld [vmem:[#allocation5 + $0x604] sm:$0xf]  ;;  %v2571_v0 = vor.u32 %v3292_v44, %v2568_v48  ;;  %v3283_v38 = vld [vmem:[#allocation5 + $0x1b4] sm:$0xf0] }
  0x8d   : > { %v2824_v54 = vld [vmem:[#allocation5 + $0x410] sm:$0xf0]  ;;  %v2699_v1 = vor.u32 %v3324_v49, %v2696_v50  ;;  %v2382_v40 = vld [vmem:[#allocation5 + $0x88] sm:$0xf]  ;;  %v3311_v44 = vld [vmem:[#allocation5 + $0x294] sm:$0xf0] }
  0x8e   : > { %1642 = vmatpush.bf16.msra.mxu3 %v2891_v9  ;;  %v3080_v61 = vld [vmem:[#allocation5 + $0x610] sm:$0xf0]  ;;  %v2827_v4 = vor.u32 %v3356_v53, %v2824_v54  ;;  %v2638_v43 = vld [vmem:[#allocation5 + $0x288] sm:$0xf]  ;;  %v3343_v48 = vld [vmem:[#allocation5 + $0x394] sm:$0xf0] }
  0x8f   : > { %1654 = vmatpush.bf16.msrb.mxu2 %v3035_v2  ;;  %1617 = vmatpush.bf16.msra.mxu0 %v2619_v16  ;;  %v3388_v2 = vld [vmem:[#allocation5 + $0x504] sm:$0xf]  ;;  %v2952_v3 = vld [vmem:[#allocation5 + $0x510] sm:$0xf0]  ;;  %v3083_v9 = vor.u32 %v3420_v59, %v3080_v61  ;;  %v2815_v16 = vor.u32 %v3355_v8, %v2814_v6  ;;  %v2510_v50 = vld [vmem:[#allocation5 + $0x188] sm:$0xf]  ;;  %v2639_v53 = vor.u32 %v3311_v44, %v2638_v43 }
  0x90   : > { %1630 = vmatpush.bf16.msra.mxu1 %v2747_v17  ;;  %v2955_v13 = vor.u32 %v3388_v2, %v2952_v3  ;;  %v2670_v17 = vld [vmem:[#allocation5 + $0x2c8] sm:$0xf]  ;;  %v3243_v56 = vld [vmem:[#allocation5 + $0x74] sm:$0xf0] }
  0x91   : > { %v2671_v25 = vor.u32 %v3319_v18, %v2670_v17  ;;  %v2366_v54 = vld [vmem:[#allocation5 + $0x68] sm:$0xf]  ;;  %v3339_v63 = vld [vmem:[#allocation5 + $0x374] sm:$0xf0] }
  0x92   : > { %1643 = vmatpush.bf16.msra.mxu3 %v2875_v21  ;;  %v3351_v21 = vld [vmem:[#allocation5 + $0x3d4] sm:$0xf0]  ;;  %v2622_v59 = vld [vmem:[#allocation5 + $0x268] sm:$0xf] }
  0x93   : > { %1655 = vmatpush.bf16.msrb.mxu2 %v3019_v15  ;;  %1618 = vmatpush.bf16.msra.mxu0 %v2603_v28  ;;  %v3255_v15 = vld [vmem:[#allocation5 + $0xd4] sm:$0xf0]  ;;  %v2799_v28 = vor.u32 %v3351_v21, %v2798_v20  ;;  %v2750_v62 = vld [vmem:[#allocation5 + $0x368] sm:$0xf] }
  0x94   : > { %1631 = vmatpush.bf16.msra.mxu1 %v2731_v29  ;;  %v2415_v22 = vor.u32 %v3255_v15, %v2414_v14  ;;  %v2654_v29 = vld [vmem:[#allocation5 + $0x2a8] sm:$0xf]  ;;  %v3275_v2 = vld [vmem:[#allocation5 + $0x174] sm:$0xf0]  ;;  %v2751_v6 = vor.u32 %v3339_v63, %v2750_v62 }
  0x95   : > { %v2655_v39 = vor.u32 %v3315_v31, %v2654_v29  ;;  %v2606_v8 = vld [vmem:[#allocation5 + $0x248] sm:$0xf]  ;;  %v3271_v15 = vld [vmem:[#allocation5 + $0x154] sm:$0xf0] }
  0x96   : > { %1644 = vmatpush.bf16.msra.mxu3 %v2859_v34  ;;  %v3347_v34 = vld [vmem:[#allocation5 + $0x3b4] sm:$0xf0]  ;;  %v2734_v11 = vld [vmem:[#allocation5 + $0x348] sm:$0xf] }
  0x97   : > { %1656 = vmatpush.bf16.msrb.mxu2 %v3003_v27  ;;  %1619 = vmatpush.bf16.msra.mxu0 %v2587_v46  ;;  %v3251_v27 = vld [vmem:[#allocation5 + $0xb4] sm:$0xf0]  ;;  %v2783_v42 = vor.u32 %v3347_v34, %v2782_v33  ;;  %v2527_v46 = vor.u32 %v3283_v38, %v2526_v37  ;;  %v2478_v14 = vld [vmem:[#allocation5 + $0x148] sm:$0xf] }
  0x98   : > { %1632 = vmatpush.bf16.msra.mxu1 %v2715_v47  ;;  %v2399_v36 = vor.u32 %v3251_v27, %v2398_v26  ;;  %v2766_v47 = vld [vmem:[#allocation5 + $0x388] sm:$0xf]  ;;  %v3235_v18 = vld [vmem:[#allocation5 + $0x34] sm:$0xf0] }
  0x99   : > { %v2767_v58 = vor.u32 %v3343_v48, %v2766_v47  ;;  %v2334_v17 = vld [vmem:[#allocation5 + $0x28] sm:$0xf]  ;;  %v3299_v21 = vld [vmem:[#allocation5 + $0x234] sm:$0xf0]  ;;  %v3257_v47 = vld [vmem:[#allocation5 + $0xec] sm:$0xf] }
  0x9a   : > { %1645 = vmatpush.bf16.msra.mxu3 %v2843_v52  ;;  %v3279_v52 = vld [vmem:[#allocation5 + $0x194] sm:$0xf0]  ;;  %v2590_v20 = vld [vmem:[#allocation5 + $0x228] sm:$0xf]  ;;  %v2432_v48 = vld [vmem:[#allocation5 + $0xf8] sm:$0xf0] }
  0x9b   : > { %1657 = vmatpush.bf16.msrb.mxu2 %v2987_v41  ;;  %1620 = vmatpush.bf16.msra.mxu0 %v2571_v0  ;;  %v3247_v41 = vld [vmem:[#allocation5 + $0x94] sm:$0xf0]  ;;  %v2511_v61 = vor.u32 %v3279_v52, %v2510_v50  ;;  %v2367_v0 = vor.u32 %v3243_v56, %v2366_v54  ;;  %v2718_v23 = vld [vmem:[#allocation5 + $0x328] sm:$0xf]  ;;  %v2591_v29 = vor.u32 %v3299_v21, %v2590_v20 }
  0x9c   : > { %1633 = vmatpush.bf16.msra.mxu1 %v2699_v1  ;;  %v2383_v49 = vor.u32 %v3247_v41, %v2382_v40  ;;  %v2494_v1 = vld [vmem:[#allocation5 + $0x168] sm:$0xf]  ;;  %v3331_v24 = vld [vmem:[#allocation5 + $0x334] sm:$0xf0]  ;;  %v2435_v63 = vor.u32 %v3257_v47, %v2432_v48 }
  0x9d   : > { %v2495_v10 = vor.u32 %v3275_v2, %v2494_v1  ;;  %v2462_v26 = vld [vmem:[#allocation5 + $0x128] sm:$0xf]  ;;  %v3267_v27 = vld [vmem:[#allocation5 + $0x134] sm:$0xf0]  ;;  %v2719_v34 = vor.u32 %v3331_v24, %v2718_v23  ;;  %v3253_v1 = vld [vmem:[#allocation5 + $0xcc] sm:$0xf] }
  0x9e   : > { %1646 = vmatpush.bf16.msra.mxu3 %v2827_v4  ;;  %1621 = vmatmul.bf16.vlgmr.msra.gmra.mxu0 %v3902_v51  ;;  %v2350_v4 = vld [vmem:[#allocation5 + $0x48] sm:$0xf]  ;;  %v3231_v31 = vld [vmem:[#allocation5 + $0x14] sm:$0xf0]  ;;  %v2463_v40 = vor.u32 %v3267_v27, %v2462_v26  ;;  %v2416_v2 = vld [vmem:[#allocation5 + $0xd8] sm:$0xf0] }
  0x9f   : > { %1658 = vmatpush.bf16.msrb.mxu2 %v2971_v60  ;;  %1704 = vmatpush.bf16.msrb.mxu0 %v2687_v12  ;;  %v3307_v60 = vld [vmem:[#allocation5 + $0x274] sm:$0xf0]  ;;  %v2574_v37 = vld [vmem:[#allocation5 + $0x208] sm:$0xf]  ;;  %v2528_v23 = vld [vmem:[#allocation5 + $0x1b8] sm:$0xf0] }
  0xa0   : > { %1678 = vmatpush.bf16.msrb.mxu1 %v2431_v5  ;;  %v2623_v3 = vor.u32 %v3307_v60, %v2622_v59  ;;  %v3239_v5 = vld [vmem:[#allocation5 + $0x54] sm:$0xf0]  ;;  %v3070_v52 = vld [vmem:[#allocation5 + $0x5e8] sm:$0xf]  ;;  %v3289_v60 = vld [vmem:[#allocation5 + $0x1ec] sm:$0xf] }
  0xa1   : > { %1647 = vmatmul.bf16.vlgmr.msra.gmra.mxu3 %v3922_v30  ;;  %1634 = vmatmul.bf16.vlgmr.msra.gmra.mxu1 %v3906_v57  ;;  %v3335_v12 = vld [vmem:[#allocation5 + $0x354] sm:$0xf0]  ;;  %v2926_v54 = vld [vmem:[#allocation5 + $0x4c8] sm:$0xf]  ;;  %v3245_v26 = vld [vmem:[#allocation5 + $0x8c] sm:$0xf] }
  0xa2   : > { %1672 = vmatpush.bf16.msrb.mxu3 %v3083_v9  ;;  %v3303_v9 = vld [vmem:[#allocation5 + $0x254] sm:$0xf0]  ;;  %v2894_v20 = vld [vmem:[#allocation5 + $0x488] sm:$0xf]  ;;  %v2384_v27 = vld [vmem:[#allocation5 + $0x98] sm:$0xf0] }
  0xa3   : > { %1659 = vmatpush.bf16.msrb.mxu2 %v2955_v13  ;;  %1705 = vmatpush.bf16.msrb.mxu0 %v2671_v25  ;;  %v2351_v13 = vor.u32 %v3239_v5, %v2350_v4  ;;  %v2335_v25 = vor.u32 %v3235_v18, %v2334_v17  ;;  %v3387_v33 = vld [vmem:[#allocation5 + $0x4f4] sm:$0xf0]  ;;  %v3054_v5 = vld [vmem:[#allocation5 + $0x5c8] sm:$0xf] }
  0xa4   : > { %1679 = vmatpush.bf16.msrb.mxu1 %v2415_v22  ;;  %v2479_v22 = vor.u32 %v3271_v15, %v2478_v14  ;;  %v3295_v38 = vld [vmem:[#allocation5 + $0x214] sm:$0xf0]  ;;  %v3249_v14 = vld [vmem:[#allocation5 + $0xac] sm:$0xf]  ;;  %v2400_v15 = vld [vmem:[#allocation5 + $0xb8] sm:$0xf0] }
  0xa5   : > { %v3327_v41 = vld [vmem:[#allocation5 + $0x314] sm:$0xf0]  ;;  %v2575_v50 = vor.u32 %v3295_v38, %v2574_v37  ;;  %v3038_v18 = vld [vmem:[#allocation5 + $0x5a8] sm:$0xf]  ;;  %v2403_v24 = vor.u32 %v3249_v14, %v2400_v15  ;;  %v2512_v37 = vld [vmem:[#allocation5 + $0x198] sm:$0xf0]  ;;  %v2387_v38 = vor.u32 %v3245_v26, %v2384_v27 }
  0xa6   : > { %1691 = vmatpush.bf16.msra.mxu3 %v2559_v19  ;;  %1660 = vmatmul.bf16.vlgmr.msrb.gmra.mxu2 %v3924_v35  ;;  %v2735_v19 = vor.u32 %v3335_v12, %v2734_v11  ;;  %v3423_v43 = vld [vmem:[#allocation5 + $0x614] sm:$0xf0]  ;;  %v2544_v11 = vld [vmem:[#allocation5 + $0x1d8] sm:$0xf0]  ;;  %v2419_v12 = vor.u32 %v3253_v1, %v2416_v2  ;;  %v2862_v47 = vld [vmem:[#allocation5 + $0x448] sm:$0xf] }
  0xa7   : > { %1717 = vmatpush.bf16.msra.mxu2 %v2815_v16  ;;  %1706 = vmatpush.bf16.msrb.mxu0 %v2655_v39  ;;  %v2607_v16 = vor.u32 %v3303_v9, %v2606_v8  ;;  %v2702_v39 = vld [vmem:[#allocation5 + $0x308] sm:$0xf]  ;;  %v3379_v9 = vld [vmem:[#allocation5 + $0x4b4] sm:$0xf0]  ;;  %v2480_v1 = vld [vmem:[#allocation5 + $0x158] sm:$0xf0] }
  0xa8   : > { %1680 = vmatpush.bf16.msrb.mxu1 %v2399_v36  ;;  %v2446_v36 = vld [vmem:[#allocation5 + $0x108] sm:$0xf]  ;;  %v2703_v56 = vor.u32 %v3327_v41, %v2702_v39  ;;  %v3375_v21 = vld [vmem:[#allocation5 + $0x494] sm:$0xf0]  ;;  %v2368_v41 = vld [vmem:[#allocation5 + $0x78] sm:$0xf0] }
  0xa9   : > { %v2910_v8 = vld [vmem:[#allocation5 + $0x4a8] sm:$0xf]  ;;  %v3367_v48 = vld [vmem:[#allocation5 + $0x454] sm:$0xf0]  ;;  %v2464_v14 = vld [vmem:[#allocation5 + $0x138] sm:$0xf0] }
  0xaa   : > { %1692 = vmatpush.bf16.msra.mxu3 %v2543_v32  ;;  %v2942_v32 = vld [vmem:[#allocation5 + $0x4e8] sm:$0xf]  ;;  %v2816_v26 = vld [vmem:[#allocation5 + $0x3f8] sm:$0xf0] }
  0xab   : > { %1718 = vmatpush.bf16.msra.mxu2 %v2799_v28  ;;  %1707 = vmatpush.bf16.msrb.mxu0 %v2639_v53  ;;  %v2318_v28 = vld [vmem:[#allocation5 + $0x8] sm:$0xf]  ;;  %v3419_v53 = vld [vmem:[#allocation5 + $0x5f4] sm:$0xf0] }
  0xac   : > { %1681 = vmatpush.bf16.msrb.mxu1 %v2383_v49  ;;  %v2319_v44 = vor.u32 %v3231_v31, %v2318_v28  ;;  %v2943_v49 = vor.u32 %v3387_v33, %v2942_v32  ;;  %v2895_v28 = vor.u32 %v3375_v21, %v2894_v20  ;;  %v3022_v31 = vld [vmem:[#allocation5 + $0x588] sm:$0xf]  ;;  %v3407_v32 = vld [vmem:[#allocation5 + $0x594] sm:$0xf0]  ;;  %v3229_v20 = vld [vmem:[#allocation5 + $0xc] sm:$0xf] }
  0xad   : > { %v2878_v33 = vld [vmem:[#allocation5 + $0x468] sm:$0xf]  ;;  %v3023_v39 = vor.u32 %v3407_v32, %v3022_v31  ;;  %v2320_v21 = vld [vmem:[#allocation5 + $0x18] sm:$0xf0]  ;;  %v3317_v31 = vld [vmem:[#allocation5 + $0x2cc] sm:$0xf] }
  0xae   : > { %1693 = vmatpush.bf16.msra.mxu3 %v2527_v46  ;;  %v3263_v46 = vld [vmem:[#allocation5 + $0x114] sm:$0xf0]  ;;  %v2323_v32 = vor.u32 %v3229_v20, %v2320_v21  ;;  %v3337_v20 = vld [vmem:[#allocation5 + $0x36c] sm:$0xf] }
  0xaf   : > { %1719 = vmatpush.bf16.msra.mxu2 %v2783_v42  ;;  %1708 = vmatpush.bf16.msrb.mxu0 %v2623_v3  ;;  %v3086_v42 = vld [vmem:[#allocation5 + $0x608] sm:$0xf]  ;;  %v2447_v62 = vor.u32 %v3263_v46, %v2446_v36  ;;  %v3277_v36 = vld [vmem:[#allocation5 + $0x18c] sm:$0xf]  ;;  %v3403_v46 = vld [vmem:[#allocation5 + $0x574] sm:$0xf0] }
  0xb0   : > { %1682 = vmatpush.bf16.msrb.mxu1 %v2367_v0  ;;  %v3087_v59 = vor.u32 %v3423_v43, %v3086_v42  ;;  %v3071_v0 = vor.u32 %v3419_v53, %v3070_v52  ;;  %v2515_v43 = vor.u32 %v3277_v36, %v2512_v37  ;;  %v2448_v36 = vld [vmem:[#allocation5 + $0x118] sm:$0xf0] }
  0xb1   : > { %3093 = vmatmul.msk.bf16.vlgmr.msrb.gmra.mxu3 %vm1492_vm0, %v3916_v45 }
  0xb2   : > { %1694 = vmatpush.bf16.msra.mxu3 %v2511_v61  ;;  %v2560_v61 = vld [vmem:[#allocation5 + $0x1f8] sm:$0xf0] }
  0xb3   : > { %1720 = vmatpush.bf16.msra.mxu2 %v2767_v58  ;;  %1709 = vmatpush.bf16.msrb.mxu0 %v2607_v16  ;;  %v3383_v58 = vld [vmem:[#allocation5 + $0x4d4] sm:$0xf0]  ;;  %v2563_v4 = vor.u32 %v3289_v60, %v2560_v61  ;;  %v2911_v16 = vor.u32 %v3379_v9, %v2910_v8  ;;  %v2990_v60 = vld [vmem:[#allocation5 + $0x548] sm:$0xf] }
  0xb4   : > { %1683 = vmatpush.bf16.msrb.mxu1 %v2351_v13  ;;  %v2927_v3 = vor.u32 %v3383_v58, %v2926_v54  ;;  %v3237_v54 = vld [vmem:[#allocation5 + $0x4c] sm:$0xf]  ;;  %v2863_v58 = vor.u32 %v3367_v48, %v2862_v47  ;;  %v3399_v61 = vld [vmem:[#allocation5 + $0x554] sm:$0xf0]  ;;  %v2974_v9 = vld [vmem:[#allocation5 + $0x528] sm:$0xf] }
  0xb5   : > { %v3381_v47 = vld [vmem:[#allocation5 + $0x4cc] sm:$0xf]  ;;  %v2928_v48 = vld [vmem:[#allocation5 + $0x4d8] sm:$0xf0] }
  0xb6   : > { %1695 = vmatpush.bf16.msra.mxu3 %v2495_v10  ;;  %v3285_v10 = vld [vmem:[#allocation5 + $0x1cc] sm:$0xf] }
  0xb7   : > { %1721 = vmatpush.bf16.msra.mxu2 %v2751_v6  ;;  %1710 = vmatpush.bf16.msrb.mxu0 %v2591_v29  ;;  %v3415_v6 = vld [vmem:[#allocation5 + $0x5d4] sm:$0xf0]  ;;  %v2547_v17 = vor.u32 %v3285_v10, %v2544_v11  ;;  %v2830_v11 = vld [vmem:[#allocation5 + $0x408] sm:$0xf] }
  0xb8   : > { %1684 = vmatpush.bf16.msrb.mxu1 %v2335_v25  ;;  %v3055_v13 = vor.u32 %v3415_v6, %v3054_v5  ;;  %v2336_v5 = vld [vmem:[#allocation5 + $0x38] sm:$0xf0]  ;;  %v3395_v10 = vld [vmem:[#allocation5 + $0x534] sm:$0xf0] }
  0xba   : > { %1696 = vmatpush.bf16.msra.mxu3 %v2479_v22  ;;  %v3281_v22 = vld [vmem:[#allocation5 + $0x1ac] sm:$0xf] }
  0xbb   : > { %1722 = vmatpush.bf16.msra.mxu2 %v2735_v19  ;;  %1711 = vmatpush.bf16.msrb.mxu0 %v2575_v50  ;;  %v3411_v19 = vld [vmem:[#allocation5 + $0x5b4] sm:$0xf0]  ;;  %v2531_v29 = vor.u32 %v3281_v22, %v2528_v23  ;;  %v2496_v50 = vld [vmem:[#allocation5 + $0x178] sm:$0xf0] }
  0xbc   : > { %1685 = vmatpush.bf16.msrb.mxu1 %v2319_v44  ;;  %v3039_v25 = vor.u32 %v3411_v19, %v3038_v18  ;;  %v3006_v44 = vld [vmem:[#allocation5 + $0x568] sm:$0xf]  ;;  %v2975_v18 = vor.u32 %v3395_v10, %v2974_v9  ;;  %v2768_v10 = vld [vmem:[#allocation5 + $0x398] sm:$0xf0] }
  0xbd   : > { %v3007_v53 = vor.u32 %v3403_v46, %v3006_v44  ;;  %v2958_v19 = vld [vmem:[#allocation5 + $0x508] sm:$0xf]  ;;  %v2800_v46 = vld [vmem:[#allocation5 + $0x3d8] sm:$0xf0] }
  0xbe   : > { %1697 = vmatpush.bf16.msra.mxu3 %v2463_v40  ;;  %1712 = vmatmul.bf16.vlgmr.msrb.gmra.mxu0 %v3902_v51  ;;  %v3241_v40 = vld [vmem:[#allocation5 + $0x6c] sm:$0xf] }
  0xbf   : > { %1723 = vmatpush.bf16.msra.mxu2 %v2719_v34  ;;  %1763 = vmatpush.bf16.msra.mxu0 %v3087_v59  ;;  %v3371_v34 = vld [vmem:[#allocation5 + $0x474] sm:$0xf0]  ;;  %v2371_v52 = vor.u32 %v3241_v40, %v2368_v41 }
  0xc0   : > { %1730 = vmatpush.bf16.msra.mxu1 %v2943_v49  ;;  %v2879_v42 = vor.u32 %v3371_v34, %v2878_v33  ;;  %v3273_v49 = vld [vmem:[#allocation5 + $0x16c] sm:$0xf]  ;;  %v2672_v33 = vld [vmem:[#allocation5 + $0x2d8] sm:$0xf0] }
  0xc1   : > { %1686 = vmatmul.bf16.vlgmr.msrb.gmra.mxu1 %v3904_v55  ;;  %v2499_v59 = vor.u32 %v3273_v49, %v2496_v50  ;;  %v3261_v34 = vld [vmem:[#allocation5 + $0x10c] sm:$0xf] }
  0xc2   : > { %1698 = vmatpush.bf16.msra.mxu3 %v2447_v62  ;;  %v2846_v62 = vld [vmem:[#allocation5 + $0x428] sm:$0xf]  ;;  %v2451_v44 = vor.u32 %v3261_v34, %v2448_v36  ;;  %v3313_v50 = vld [vmem:[#allocation5 + $0x2ac] sm:$0xf] }
  0xc3   : > { %1724 = vmatpush.bf16.msra.mxu2 %v2703_v56  ;;  %1782 = vmatpush.bf16.msrb.mxu0 %v2563_v4  ;;  %v2352_v56 = vld [vmem:[#allocation5 + $0x58] sm:$0xf0]  ;;  %v3233_v4 = vld [vmem:[#allocation5 + $0x2c] sm:$0xf] }
  0xc4   : > { %1731 = vmatpush.bf16.msra.mxu1 %v2927_v3  ;;  %v2355_v2 = vor.u32 %v3237_v54, %v2352_v56  ;;  %v2991_v3 = vor.u32 %v3399_v61, %v2990_v60  ;;  %v2339_v15 = vor.u32 %v3233_v4, %v2336_v5  ;;  %v3056_v54 = vld [vmem:[#allocation5 + $0x5d8] sm:$0xf0]  ;;  %v3333_v34 = vld [vmem:[#allocation5 + $0x34c] sm:$0xf] }
  0xc5   : > { %1699 = vmatmul.bf16.vlgmr.msra.gmra.mxu3 %v3911_v7  ;;  %v2784_v61 = vld [vmem:[#allocation5 + $0x3b8] sm:$0xf0] }
  0xc6   : > { %1743 = vmatpush.bf16.msrb.mxu3 %v3071_v0  ;;  %1725 = vmatmul.bf16.vlgmr.msra.gmra.mxu2 %v3906_v57  ;;  %v3269_v0 = vld [vmem:[#allocation5 + $0x14c] sm:$0xf]  ;;  %v3040_v4 = vld [vmem:[#allocation5 + $0x5b8] sm:$0xf0] }
  0xc7   : > { %1769 = vmatpush.bf16.msrb.mxu2 %v2435_v63  ;;  %1783 = vmatpush.bf16.msrb.mxu0 %v2547_v17  ;;  %v3363_v63 = vld [vmem:[#allocation5 + $0x434] sm:$0xf0]  ;;  %v2483_v8 = vor.u32 %v3269_v0, %v2480_v1  ;;  %v2688_v17 = vld [vmem:[#allocation5 + $0x2f8] sm:$0xf0]  ;;  %v3309_v1 = vld [vmem:[#allocation5 + $0x28c] sm:$0xf] }
  0xc8   : > { %1732 = vmatpush.bf16.msra.mxu1 %v2911_v16  ;;  %v2847_v6 = vor.u32 %v3363_v63, %v2846_v62  ;;  %v3321_v16 = vld [vmem:[#allocation5 + $0x2ec] sm:$0xf]  ;;  %v2912_v63 = vld [vmem:[#allocation5 + $0x4b8] sm:$0xf0] }
  0xc9   : > { %v2691_v27 = vor.u32 %v3321_v16, %v2688_v17  ;;  %v3377_v62 = vld [vmem:[#allocation5 + $0x4ac] sm:$0xf]  ;;  %v3024_v17 = vld [vmem:[#allocation5 + $0x598] sm:$0xf0] }
  0xca   : > { %1744 = vmatpush.bf16.msrb.mxu3 %v3055_v13  ;;  %v3265_v13 = vld [vmem:[#allocation5 + $0x12c] sm:$0xf] }
  0xcb   : > { %1770 = vmatpush.bf16.msrb.mxu2 %v2419_v12  ;;  %1784 = vmatpush.bf16.msrb.mxu0 %v2531_v29  ;;  %v3359_v12 = vld [vmem:[#allocation5 + $0x414] sm:$0xf0]  ;;  %v2467_v23 = vor.u32 %v3265_v13, %v2464_v14  ;;  %v2944_v29 = vld [vmem:[#allocation5 + $0x4f8] sm:$0xf0]  ;;  %v3305_v14 = vld [vmem:[#allocation5 + $0x26c] sm:$0xf] }
  0xcc   : > { %1733 = vmatpush.bf16.msra.mxu1 %v2895_v28  ;;  %v2831_v22 = vor.u32 %v3359_v12, %v2830_v11  ;;  %v3385_v28 = vld [vmem:[#allocation5 + $0x4ec] sm:$0xf]  ;;  %v2896_v12 = vld [vmem:[#allocation5 + $0x498] sm:$0xf0] }
  0xcd   : > { %v2947_v41 = vor.u32 %v3385_v28, %v2944_v29  ;;  %v3373_v11 = vld [vmem:[#allocation5 + $0x48c] sm:$0xf]  ;;  %v3008_v29 = vld [vmem:[#allocation5 + $0x578] sm:$0xf0] }
  0xce   : > { %1745 = vmatpush.bf16.msrb.mxu3 %v3039_v25  ;;  %3094 = vmatmul.msk.bf16.vlgmr.msra.gmra.mxu0 %vm1492_vm0, %v3916_v45  ;;  %v3353_v25 = vld [vmem:[#allocation5 + $0x3ec] sm:$0xf] }
  0xcf   : > { %1771 = vmatpush.bf16.msrb.mxu2 %v2403_v24  ;;  %1785 = vmatpush.bf16.msrb.mxu0 %v2515_v43  ;;  %v3391_v24 = vld [vmem:[#allocation5 + $0x514] sm:$0xf0]  ;;  %v2819_v40 = vor.u32 %v3353_v25, %v2816_v26  ;;  %v2675_v43 = vor.u32 %v3317_v31, %v2672_v33  ;;  %v3301_v26 = vld [vmem:[#allocation5 + $0x24c] sm:$0xf] }
  0xd0   : > { %1734 = vmatpush.bf16.msra.mxu1 %v2879_v42  ;;  %v2959_v37 = vor.u32 %v3391_v24, %v2958_v19  ;;  %v3349_v42 = vld [vmem:[#allocation5 + $0x3cc] sm:$0xf]  ;;  %v2899_v19 = vor.u32 %v3373_v11, %v2896_v12  ;;  %v2880_v24 = vld [vmem:[#allocation5 + $0x478] sm:$0xf0] }
  0xd1   : > { %v2803_v56 = vor.u32 %v3349_v42, %v2800_v46  ;;  %v3401_v28 = vld [vmem:[#allocation5 + $0x56c] sm:$0xf] }
  0xd2   : > { %1746 = vmatpush.bf16.msrb.mxu3 %v3023_v39  ;;  %v3072_v39 = vld [vmem:[#allocation5 + $0x5f8] sm:$0xf0]  ;;  %v3297_v42 = vld [vmem:[#allocation5 + $0x22c] sm:$0xf] }
  0xd3   : > { %1772 = vmatpush.bf16.msrb.mxu2 %v2387_v38  ;;  %1786 = vmatpush.bf16.msrb.mxu0 %v2499_v59  ;;  %v3417_v38 = vld [vmem:[#allocation5 + $0x5ec] sm:$0xf] }
  0xd4   : > { %1735 = vmatpush.bf16.msra.mxu1 %v2863_v58  ;;  %v3075_v49 = vor.u32 %v3417_v38, %v3072_v39  ;;  %v2931_v58 = vor.u32 %v3381_v47, %v2928_v48  ;;  %v3345_v59 = vld [vmem:[#allocation5 + $0x3ac] sm:$0xf]  ;;  %v2736_v38 = vld [vmem:[#allocation5 + $0x358] sm:$0xf0] }
  0xd5   : > { %v2787_v5 = vor.u32 %v3345_v59, %v2784_v61  ;;  %v3365_v39 = vld [vmem:[#allocation5 + $0x44c] sm:$0xf]  ;;  %v2992_v47 = vld [vmem:[#allocation5 + $0x558] sm:$0xf0]  ;;  %v2739_v48 = vor.u32 %v3333_v34, %v2736_v38 }
  0xd6   : > { %1747 = vmatpush.bf16.msrb.mxu3 %v3007_v53  ;;  %v3413_v53 = vld [vmem:[#allocation5 + $0x5cc] sm:$0xf] }
  0xd7   : > { %1773 = vmatpush.bf16.msrb.mxu2 %v2371_v52  ;;  %1787 = vmatpush.bf16.msrb.mxu0 %v2483_v8  ;;  %v2656_v52 = vld [vmem:[#allocation5 + $0x2b8] sm:$0xf0]  ;;  %v3059_v0 = vor.u32 %v3413_v53, %v3056_v54  ;;  %v3341_v8 = vld [vmem:[#allocation5 + $0x38c] sm:$0xf] }
  0xd8   : > { %1736 = vmatpush.bf16.msra.mxu1 %v2847_v6  ;;  %v2659_v60 = vor.u32 %v3313_v50, %v2656_v52  ;;  %v2915_v6 = vor.u32 %v3377_v62, %v2912_v63  ;;  %v3397_v46 = vld [vmem:[#allocation5 + $0x54c] sm:$0xf]  ;;  %v2720_v53 = vld [vmem:[#allocation5 + $0x338] sm:$0xf0] }
  0xd9   : > { %v3329_v50 = vld [vmem:[#allocation5 + $0x32c] sm:$0xf]  ;;  %v2976_v63 = vld [vmem:[#allocation5 + $0x538] sm:$0xf0] }
  0xda   : > { %1748 = vmatpush.bf16.msrb.mxu3 %v2991_v3  ;;  %v3409_v3 = vld [vmem:[#allocation5 + $0x5ac] sm:$0xf] }
  0xdb   : > { %1774 = vmatpush.bf16.msrb.mxu2 %v2355_v2  ;;  %1788 = vmatpush.bf16.msrb.mxu0 %v2467_v23  ;;  %v2640_v2 = vld [vmem:[#allocation5 + $0x298] sm:$0xf0]  ;;  %v3043_v13 = vor.u32 %v3409_v3, %v3040_v4  ;;  %v3369_v23 = vld [vmem:[#allocation5 + $0x46c] sm:$0xf]  ;;  %v2723_v3 = vor.u32 %v3329_v50, %v2720_v53 }
  0xdc   : > { %1737 = vmatpush.bf16.msra.mxu1 %v2831_v22  ;;  %v2643_v9 = vor.u32 %v3309_v1, %v2640_v2  ;;  %v2752_v22 = vld [vmem:[#allocation5 + $0x378] sm:$0xf0]  ;;  %v2883_v33 = vor.u32 %v3369_v23, %v2880_v24  ;;  %v3361_v54 = vld [vmem:[#allocation5 + $0x42c] sm:$0xf] }
  0xdd   : > { %v3293_v59 = vld [vmem:[#allocation5 + $0x20c] sm:$0xf]  ;;  %v3088_v1 = vld [vmem:[#allocation5 + $0x618] sm:$0xf0] }
  0xde   : > { %1749 = vmatpush.bf16.msrb.mxu3 %v2975_v18  ;;  %v2771_v18 = vor.u32 %v3341_v8, %v2768_v10  ;;  %v3393_v61 = vld [vmem:[#allocation5 + $0x52c] sm:$0xf]  ;;  %v3439_v24 = vld [vmem:[#allocation8 + $0x78] sm:$0xff] }
  0xdf   : > { %1775 = vmatpush.bf16.msrb.mxu2 %v2339_v15  ;;  %1738 = vmatmul.bf16.vlgmr.msra.gmra.mxu1 %v3922_v30  ;;  %v2624_v15 = vld [vmem:[#allocation5 + $0x278] sm:$0xf0]  ;;  %v3946_v16 = vpop.f32.mrf.mxu0  ;;  %v3325_v8 = vld [vmem:[#allocation5 + $0x30c] sm:$0xf]  ;;  %v2979_v11 = vor.u32 %v3393_v61, %v2976_v63 }
  0xe0   : > { %1795 = vmatpush.bf16.msrb.mxu1 %v2691_v27  ;;  %1789 = vmatpush.bf16.msrb.mxu0 %v2451_v44  ;;  %v2627_v21 = vor.u32 %v3305_v14, %v2624_v15  ;;  %v2608_v27 = vld [vmem:[#allocation5 + $0x258] sm:$0xf0]  ;;  %v3357_v12 = vld [vmem:[#allocation5 + $0x40c] sm:$0xf] }
  0xe1   : > { %v2611_v36 = vor.u32 %v3301_v26, %v2608_v27  ;;  %v3389_v15 = vld [vmem:[#allocation5 + $0x50c] sm:$0xf] }
  0xe2   : > { %1750 = vmatpush.bf16.msrb.mxu3 %v2959_v37  ;;  %v3948_v25 = vpop.f32.mrf.mxu1  ;;  %v3437_v34 = vld [vmem:[#allocation8 + $0x68] sm:$0xff] }
  0xe3   : > { %1776 = vmatpush.bf16.msrb.mxu2 %v2323_v32  ;;  %1790 = vmatmul.bf16.vlgmr.msrb.gmra.mxu0 %v3911_v7  ;;  %v2755_v32 = vor.u32 %v3337_v20, %v2752_v22  ;;  %v3431_v20 = vld [vmem:[#allocation8 + $0x38] sm:$0xff]  ;;  %v3433_v50 = vld [vmem:[#allocation8 + $0x48] sm:$0xff] }
  0xe4   : > { %1796 = vmatpush.bf16.msrb.mxu1 %v2675_v43  ;;  %1834 = vmatpush.bf16.msra.mxu0 %v3075_v49  ;;  %v3950_v31 = vpop.f32.mrf.mxu2  ;;  %v3952_v37 = vpop.f32.mrf.mxu3  ;;  %v2592_v43 = vld [vmem:[#allocation5 + $0x238] sm:$0xf0] }
  0xe5   : > { %1751 = vmatmul.bf16.vlgmr.msrb.gmra.mxu3 %v3924_v35  ;;  %v2595_v52 = vor.u32 %v3297_v42, %v2592_v43  ;;  %v3435_v42 = vld [vmem:[#allocation8 + $0x58] sm:$0xff]  ;;  %v3425_v43 = vld [vmem:[#allocation8 + $0x8] sm:$0xff] }
  0xe6   : > { %1808 = vmatpush.bf16.msra.mxu3 %v2819_v40  ;;  %1777 = vmatmul.bf16.vlgmr.msrb.gmra.mxu2 %v3904_v55  ;;  %v3405_v55 = vld [vmem:[#allocation5 + $0x58c] sm:$0xf]  ;;  %v2864_v40 = vld [vmem:[#allocation5 + $0x458] sm:$0xf0] }
  0xe7   : > { %1821 = vmatpush.bf16.msra.mxu2 %v2947_v41  ;;  %v3027_v7 = vor.u32 %v3405_v55, %v3024_v17  ;;  %v3011_v41 = vor.u32 %v3401_v28, %v3008_v29  ;;  %v1507_v44 = vpop.f32.mrf.mxu0  ;;  %v2867_v49 = vor.u32 %v3365_v39, %v2864_v40  ;;  %v2960_v55 = vld [vmem:[#allocation5 + $0x518] sm:$0xf0] }
  0xe8   : > { %1797 = vmatpush.bf16.msrb.mxu1 %v2659_v60  ;;  %1835 = vmatpush.bf16.msra.mxu0 %v3059_v0  ;;  %v2576_v60 = vld [vmem:[#allocation5 + $0x218] sm:$0xf0]  ;;  %v3421_v0 = vld [vmem:[#allocation5 + $0x60c] sm:$0xf] }
  0xe9   : > { %v3091_v14 = vor.u32 %v3421_v0, %v3088_v1  ;;  %v3447_v1 = vld [vmem:[#allocation8 + $0xb8] sm:$0xff] }
  0xea   : > { %1809 = vmatpush.bf16.msra.mxu3 %v2803_v56  ;;  %v2848_v56 = vld [vmem:[#allocation5 + $0x438] sm:$0xf0]  ;;  %v1520_v62 = vpop.f32.mrf.mxu1 }
  0xeb   : > { %1822 = vmatpush.bf16.msra.mxu2 %v2931_v58  ;;  %v2995_v58 = vor.u32 %v3397_v46, %v2992_v47  ;;  %v2851_v4 = vor.u32 %v3361_v54, %v2848_v56  ;;  %v3424_v47 = vld [vmem:[#allocation8] sm:$0xff] }
  0xec   : > { %1798 = vmatpush.bf16.msrb.mxu1 %v2643_v9  ;;  %1836 = vmatpush.bf16.msra.mxu0 %v3043_v13  ;;  %v1533_v2 = vpop.f32.mrf.mxu2  ;;  %v2704_v9 = vld [vmem:[#allocation5 + $0x318] sm:$0xf0]  ;;  %v1546_v10 = vpop.f32.mrf.mxu3 }
  0xed   : > { %v2832_v13 = vld [vmem:[#allocation5 + $0x418] sm:$0xf0]  ;;  %v3446_v2 = vld [vmem:[#allocation8 + $0xb0] sm:$0xff] }
  0xee   : > { %1810 = vmatpush.bf16.msra.mxu3 %v2787_v5  ;;  %v3954_v5 = vld [vmem:[#allocation7] sm:$0xf] }
  0xef   : > { %1823 = vmatpush.bf16.msra.mxu2 %v2915_v6  ;;  %v2579_v6 = vor.u32 %v3293_v59, %v2576_v60  ;;  %v504_v17 = vperm.slane %v3954_v5, 0  ;;  %v505_v54 = vperm.slane %v3954_v5, 1 }
  0xf0   : > { %1799 = vmatpush.bf16.msrb.mxu1 %v2627_v21  ;;  %1837 = vmatpush.bf16.msra.mxu0 %v3027_v7  ;;  %v2963_v21 = vor.u32 %v3389_v15, %v2960_v55  ;;  %v3430_v7 = vld [vmem:[#allocation8 + $0x30] sm:$0xff]  ;;  %v3443_v55 = vld [vmem:[#allocation8 + $0x98] sm:$0xff] }
  0xf1   : > { %v1506_v22 = vadd.f32 %v3946_v16, %v504_v17  ;;  %v3429_v16 = vld [vmem:[#allocation8 + $0x28] sm:$0xff]  ;;  %v3442_v17 = vld [vmem:[#allocation8 + $0x90] sm:$0xff] }
  0xf2   : > { %1811 = vmatpush.bf16.msra.mxu3 %v2771_v18  ;;  %v2707_v18 = vor.u32 %v3325_v8, %v2704_v9  ;;  %v3445_v9 = vld [vmem:[#allocation8 + $0xa8] sm:$0xff] }
  0xf3   : > { %1824 = vmatpush.bf16.msra.mxu2 %v2899_v19  ;;  %v2835_v19 = vor.u32 %v3357_v12, %v2832_v13  ;;  %v1519_v26 = vadd.f32 %v3948_v25, %v1506_v22  ;;  %v3427_v25 = vld [vmem:[#allocation8 + $0x18] sm:$0xff] }
  0xf4   : > { %1800 = vmatpush.bf16.msrb.mxu1 %v2611_v36  ;;  %1838 = vmatpush.bf16.msra.mxu0 %v3011_v41  ;;  %v1583_v23 = vpop.f32.mrf.mxu2 }
  0xf5   : > { %v1532_v28 = vadd.f32 %v3950_v31, %v1519_v26  ;;  %v3426_v31 = vld [vmem:[#allocation8 + $0x10] sm:$0xff]  ;;  %v3440_v26 = vld [vmem:[#allocation8 + $0x80] sm:$0xff] }
  0xf6   : > { %1812 = vmatpush.bf16.msra.mxu3 %v2755_v32 }
  0xf7   : > { %1825 = vmatpush.bf16.msra.mxu2 %v2883_v33  ;;  %v3428_v33 = vld [vmem:[#allocation8 + $0x20] sm:$0xff] }
  0xf8   : > { %1801 = vmatpush.bf16.msrb.mxu1 %v2595_v52  ;;  %1839 = vmatpush.bf16.msra.mxu0 %v2995_v58  ;;  %v3432_v52 = vld [vmem:[#allocation8 + $0x40] sm:$0xff] }
  0xfa   : > { %1813 = vmatpush.bf16.msra.mxu3 %v2739_v48 }
  0xfb   : > { %1826 = vmatpush.bf16.msra.mxu2 %v2867_v49  ;;  %v1557_v27 = vpop.f32.mrf.mxu0 }
  0xfc   : > { %1802 = vmatpush.bf16.msrb.mxu1 %v2579_v6  ;;  %1840 = vmatpush.bf16.msra.mxu0 %v2979_v11  ;;  %v1585_v32 = vpop.f32.mrf.mxu2  ;;  %v3444_v11 = vld [vmem:[#allocation8 + $0xa0] sm:$0xff] }
  0xfe   : > { %1814 = vmatpush.bf16.msra.mxu3 %v2723_v3  ;;  %v1570_v29 = vpop.f32.mrf.mxu1 }
  0xff   : > { %1827 = vmatpush.bf16.msra.mxu2 %v2851_v4  ;;  %1803 = vmatmul.bf16.vlgmr.msrb.gmra.mxu1 %v3902_v51  ;;  %v3438_v51 = vld [vmem:[#allocation8 + $0x70] sm:$0xff] }
 0x100   : > { %1854 = vmatpush.bf16.msra.mxu1 %v3091_v14  ;;  %1841 = vmatpush.bf16.msra.mxu0 %v2963_v21  ;;  %v3441_v21 = vld [vmem:[#allocation8 + $0x88] sm:$0xff] }
 0x102   : > { %1815 = vmatpush.bf16.msra.mxu3 %v2707_v18 }
 0x103   : > { %1828 = vmatpush.bf16.msra.mxu2 %v2835_v19  ;;  %1842 = vmatmul.bf16.vlgmr.msra.gmra.mxu0 %v3924_v35  ;;  %v1559_v38 = vpop.f32.mrf.mxu0  ;;  %v3436_v35 = vld [vmem:[#allocation8 + $0x60] sm:$0xff] }
 0x104   : > { %2141 = vmatpush.bf16.msrb.mxu1 %v3439_v24  ;;  %v1596_v36 = vpop.f32.mrf.mxu3 }
 0x105   : > { %1816 = vmatmul.bf16.vlgmr.msra.gmra.mxu3 %v3906_v57  ;;  %v1545_v57 = vadd.f32 %v3952_v37, %v1532_v28  ;;  %v3434_v37 = vld [vmem:[#allocation8 + $0x50] sm:$0xff]  ;;  %v1597_v58 = vadd.f32 %v1596_v36, %v505_v54  ;;  %v507_v54 = vperm.slane %v3954_v5, 3 }
 0x106   : > { %2128 = vmatpush.bf16.msrb.mxu3 %v3431_v20  ;;  %1829 = vmatmul.bf16.vlgmr.msra.gmra.mxu2 %v3922_v30  ;;  %v1572_v39 = vpop.f32.mrf.mxu1  ;;  %v3454_v28 = vld [vmem:[#allocation8 + $0xf0] sm:$0xff] }
 0x107   : > { %v1558_v30 = vadd.f32 %v1557_v27, %v1545_v57  ;;  %2154 = vmatpush.bf16.msrb.mxu2 %v3447_v1  ;;  %v3453_v57 = vld [vmem:[#allocation8 + $0xe8] sm:$0xff] }
 0x108   : > { %2142 = vmatpush.bf16.msrb.mxu1 %v3438_v51 }
 0x109   : > { %v1609_v40 = vpop.f32.mrf.mxu2  ;;  %v1571_v41 = vadd.f32 %v1570_v29, %v1558_v30  ;;  %v506_v29 = vperm.slane %v3954_v5, 2  ;;  %v3452_v30 = vld [vmem:[#allocation8 + $0xe0] sm:$0xff] }
 0x10a   : > { %2129 = vmatpush.bf16.msrb.mxu3 %v3430_v7  ;;  %v1610_v62 = vadd.f32 %v1609_v40, %v1597_v58 }
 0x10b   : > { %v1584_v44 = vadd.f32 %v1583_v23, %v1571_v41  ;;  %2155 = vmatpush.bf16.msrb.mxu2 %v3446_v2 }
 0x10c   : > { %2143 = vmatpush.bf16.msrb.mxu1 %v3437_v34  ;;  %v1598_v46 = vpop.f32.mrf.mxu3 }
 0x10d   : > { %v1860_v49 = vmax.f32 %v1584_v44, 0.0 }
 0x10e   : > { %2130 = vmatpush.bf16.msrb.mxu3 %v3429_v16  ;;  %v3455_v16 = vld [vmem:[#allocation8 + $0xf8] sm:$0xff] }
 0x10f   : > { %3095 = vmatmul.msk.bf16.vlgmr.msra.gmra.mxu1 %vm1492_vm0, %v3916_v45  ;;  %v1864_v45 = vpack.c.bf16 %v1860_v49, %v1860_v49  ;;  %2156 = vmatpush.bf16.msrb.mxu2 %v3445_v9 }
 0x110   : > { %2144 = vmatpush.bf16.msrb.mxu1 %v3436_v35  ;;  %2167 = vmatpush.bf16.msrb.mxu0 %v3455_v16  ;;  %v3451_v35 = vld [vmem:[#allocation8 + $0xd8] sm:$0xff] }
 0x111   : > { %v1611_v48 = vpop.f32.mrf.mxu2 }
 0x112   : > { %2131 = vmatpush.bf16.msrb.mxu3 %v3428_v33 }
 0x113   : > { %2157 = vmatpush.bf16.msrb.mxu2 %v3444_v11 }
 0x114   : > { %2145 = vmatpush.bf16.msrb.mxu1 %v3435_v42  ;;  %2168 = vmatpush.bf16.msrb.mxu0 %v3454_v28  ;;  %v3450_v42 = vld [vmem:[#allocation8 + $0xd0] sm:$0xff] }
 0x116   : > { %2132 = vmatpush.bf16.msrb.mxu3 %v3427_v25 }
 0x117   : > { %2158 = vmatpush.bf16.msrb.mxu2 %v3443_v55 }
 0x118   : > { %2146 = vmatpush.bf16.msrb.mxu1 %v3434_v37  ;;  %2169 = vmatpush.bf16.msrb.mxu0 %v3453_v57 }
 0x11a   : > { %2133 = vmatpush.bf16.msrb.mxu3 %v3426_v31 }
 0x11b   : > { %v1622_v53 = vpop.f32.mrf.mxu0  ;;  %2159 = vmatpush.bf16.msrb.mxu2 %v3442_v17 }
 0x11c   : > { %2147 = vmatpush.bf16.msrb.mxu1 %v3433_v50  ;;  %v1623_v0 = vadd.f32 %v1622_v53, %v1610_v62  ;;  %2170 = vmatpush.bf16.msrb.mxu0 %v3452_v30 }
 0x11e   : > { %2134 = vmatpush.bf16.msrb.mxu3 %v3425_v43  ;;  %v1635_v56 = vpop.f32.mrf.mxu1 }
 0x11f   : > { %v1636_v4 = vadd.f32 %v1635_v56, %v1623_v0  ;;  %2160 = vmatpush.bf16.msrb.mxu2 %v3441_v21 }
 0x120   : > { %2148 = vmatpush.bf16.msrb.mxu1 %v3432_v52  ;;  %2171 = vmatpush.bf16.msrb.mxu0 %v3451_v35 }
 0x122   : > { %2135 = vmatpush.bf16.msrb.mxu3 %v3424_v47  ;;  %v3449_v47 = vld [vmem:[#allocation8 + $0xc8] sm:$0xff] }
 0x123   : > { %v1624_v60 = vpop.f32.mrf.mxu0  ;;  %2161 = vmatpush.bf16.msrb.mxu2 %v3440_v26 }
 0x124   : > { %v1648_v59 = vpop.f32.mrf.mxu3  ;;  %2172 = vmatpush.bf16.msrb.mxu0 %v3450_v42 }
 0x125   : > { %2136 = vmatmul.bf16.vlgmr.msrb.gmra.mxu3 %v1864_v45  ;;  %v1649_v8 = vadd.f32 %v1648_v59, %v1636_v4  ;;  %v3448_v45 = vld [vmem:[#allocation8 + $0xc0] sm:$0xff] }
 0x126   : > { %v1637_v63 = vpop.f32.mrf.mxu1 }
 0x128   : > { %2173 = vmatpush.bf16.msrb.mxu0 %v3449_v47 }
 0x129   : > { %v1661_v61 = vpop.f32.mrf.mxu2 }
 0x12a   : > { %v1662_v10 = vadd.f32 %v1661_v61, %v1649_v8 }
 0x12c   : > { %v1650_v3 = vpop.f32.mrf.mxu3  ;;  %2174 = vmatpush.bf16.msrb.mxu0 %v3448_v45 }
 0x131   : > { %v1663_v6 = vpop.f32.mrf.mxu2 }
 0x134   : > { %v1674_v12 = vpop.f32.mrf.mxu3 }
 0x135   : > { %v1675_v13 = vadd.f32 %v1674_v12, %v1662_v10 }
 0x137   : > { %v1861_v14 = vmax.f32 %v1675_v13, 0.0 }
 0x139   : > { %v1865_v15 = vpack.c.bf16 %v1861_v14, %v1861_v14 }
 0x13b   : > { %2149 = vmatmul.bf16.vlgmr.msrb.gmra.mxu1 %v1865_v15  ;;  %v1713_v19 = vpop.f32.mrf.mxu0  ;;  %v3540_v15 = vld [vmem:[%s4011_s4] ss:$0 sm:$0xff] }
 0x13c   : > { %v1676_v18 = vpop.f32.mrf.mxu3 }
 0x13e   : > { %v1687_v20 = vpop.f32.mrf.mxu1 }
 0x13f   : > { %v1688_v33 = vadd.f32 %v1687_v20, %v506_v29 }
 0x143   : > { %v1715_v23 = vpop.f32.mrf.mxu0 }
 0x146   : > { %v1689_v7 = vpop.f32.mrf.mxu1 }
 0x148   : > { %v1700_v22 = vpop.f32.mrf.mxu3 }
 0x149   : > { %v1726_v24 = vpop.f32.mrf.mxu2  ;;  %v1701_v25 = vadd.f32 %v1700_v22, %v1688_v33 }
 0x14b   : > { %v1765_v51 = vpop.f32.mrf.mxu0  ;;  %v1714_v38 = vadd.f32 %v1713_v19, %v1701_v25 }
 0x14d   : > { %v1727_v39 = vadd.f32 %v1726_v24, %v1714_v38 }
 0x150   : > { %v1702_v27 = vpop.f32.mrf.mxu3 }
 0x151   : > { %v1728_v32 = vpop.f32.mrf.mxu2 }
 0x153   : > { %v1767_v34 = vpop.f32.mrf.mxu0 }
 0x15c   : > { %v1739_v36 = vpop.f32.mrf.mxu1 }
 0x15d   : > { %v1740_v40 = vadd.f32 %v1739_v36, %v1727_v39 }
 0x160   : > { %v1791_v31 = vpop.f32.mrf.mxu0 }
 0x164   : > { %v1741_v41 = vpop.f32.mrf.mxu1 }
 0x168   : > { %v1752_v43 = vpop.f32.mrf.mxu3  ;;  %v1793_v49 = vpop.f32.mrf.mxu0 }
 0x169   : > { %v1753_v37 = vadd.f32 %v1752_v43, %v1740_v40  ;;  %v1778_v44 = vpop.f32.mrf.mxu2 }
 0x16a   : > { %v1779_v56 = vadd.f32 %v1778_v44, %v507_v54 }
 0x16b   : > { %v1766_v46 = vadd.f32 %v1765_v51, %v1753_v37 }
 0x16c   : > { %v1792_v59 = vadd.f32 %v1791_v31, %v1779_v56 }
 0x16d   : > { %v1862_v48 = vmax.f32 %v1766_v46, 0.0 }
 0x16f   : > { %v1866_v50 = vpack.c.bf16 %v1862_v48, %v1862_v48 }
 0x170   : > { %v1754_v52 = vpop.f32.mrf.mxu3 }
 0x171   : > { %2162 = vmatmul.bf16.vlgmr.msrb.gmra.mxu2 %v1866_v50  ;;  %v1780_v53 = vpop.f32.mrf.mxu2 }
 0x17c   : > { %v1804_v58 = vpop.f32.mrf.mxu1 }
 0x17d   : > { %v1805_v61 = vadd.f32 %v1804_v58, %v1792_v59 }
 0x180   : > { %v1843_v60 = vpop.f32.mrf.mxu0 }
 0x184   : > { %v1806_v62 = vpop.f32.mrf.mxu1 }
 0x188   : > { %v1817_v63 = vpop.f32.mrf.mxu3  ;;  %v1845_v3 = vpop.f32.mrf.mxu0 }
 0x189   : > { %v1818_v0 = vadd.f32 %v1817_v63, %v1805_v61  ;;  %v1830_v1 = vpop.f32.mrf.mxu2 }
 0x18b   : > { %v1831_v2 = vadd.f32 %v1830_v1, %v1818_v0 }
 0x18c   : > { %v1856_v6 = vpop.f32.mrf.mxu1 }
 0x18d   : > { %v1844_v4 = vadd.f32 %v1843_v60, %v1831_v2 }
 0x18f   : > { %v1857_v8 = vadd.f32 %v1856_v6, %v1844_v4 }
 0x190   : > { %v1819_v9 = vpop.f32.mrf.mxu3 }
 0x191   : > { %v1832_v10 = vpop.f32.mrf.mxu2  ;;  %v1863_v11 = vmax.f32 %v1857_v8, 0.0 }
 0x193   : > { %v1867_v5 = vpack.c.bf16 %v1863_v11, %v1863_v11 }
 0x194   : > { %v1858_v12 = vpop.f32.mrf.mxu1 }
 0x195   : > { %2175 = vmatmul.bf16.vlgmr.msrb.gmra.mxu0 %v1867_v5 }
 0x1a8   : > { %v2137_v13 = vpop.f32.mrf.mxu3 }
 0x1a9   : > { %v2138_v55 = vadd.f32 %v3540_v15, %v2137_v13 }
 0x1b0   : > { %v2139_v14 = vpop.f32.mrf.mxu3 }
 0x1b8   : > { %v2150_v17 = vpop.f32.mrf.mxu1 }
 0x1b9   : > { %v2151_v18 = vadd.f32 %v2150_v17, %v2138_v55 }
 0x1c0   : > { %v2152_v19 = vpop.f32.mrf.mxu1 }
 0x1f4   : > { %v2163_v20 = vpop.f32.mrf.mxu2 }
 0x1f5   : > { %v2164_v22 = vadd.f32 %v2163_v20, %v2151_v18 }
 0x1fc   : > { %v2165_v21 = vpop.f32.mrf.mxu2 }
 0x212   : > { %v2176_v23 = vpop.f32.mrf.mxu0 }
 0x213   : > { %v2177_v24 = vadd.f32 %v2176_v23, %v2164_v22 }
 0x215   : > { %2180 = vst [vmem:[%s290_s17] sm:$0xff] %v2177_v24 }
 0x216   : > { %3688 = shalt.err (!%p3685_p9)
}
 0x217   : > { %3473 = dma.vmem_to_hbm [thread:$0]  (%p3850_p0), %s2195_s22, 128, %s2197_s23, %s2182_s27  }
 0x21a   : > { %v2178_v7 = vpop.f32.mrf.mxu0 }
 0x21b PF: > { %s2208_s7 = sand.u32 1, %s3723_s18   ;;  %p4023_p10 = scmp.ge.s32.totalorder %s3735_s21, 2 }
 0x21c   : > { %s2209_s2 = scalar_lea.sflag [#allocation4], %s2208_s7 }
 0x21d   : > { %p3490_p11 = pnand %p4023_p10, %p3856_p6 }
 0x21f   : > { %p3491_p12 = pneg %p3490_p11 }
 0x221   : > { %3718 = dma.done.wait (%p3491_p12), %s2209_s2, 128  }
 0x222   : > { %3720 = vsyncadd (%p3491_p12), %s2209_s2, 4294967168  ;;  %p20_p2 = scmp.ge.s32.totalorder %s3830_s24, 4   ;;  %s4024_s18 = smov %s3727_s19 }
 0x223   : > { %s4025_s19 = smov %s3731_s20  ;;  %s4026_s20 = smov %s3842_s29 }
 0x224   : > { %s4027_s21 = smov %s3830_s24  ;;  %22 = sbr.rel (!%p20_p2) target bundleno = 10 (0xa), region = 97 }
 0x229   :  { %2215 = vsyncpa [#allocation3], 1 }
 0x22a   :  { %2217 = vsyncpa [#allocation3 + $0x1], 1 }
 0x22b   :  { %2218 = vsyncpa [#allocation6], 1 }
 0x22c   :  { %2219 = vsyncpa [#allocation9], 1 }
 0x22d   :  { %2220 = vsyncpa [#allocation4], 1 }
 0x22e   :  { %2222 = vsyncpa [#allocation4 + $0x1], 1 }

</bundles_post_ra>
